<compile_context>
chip_gen: v7x
topology: tpu7x:2x2x1
jax: 0.10.0
libtpu: 0.0.40
codegen_flags: <defaults>
</compile_context>

<pallas_src>
import functools
import math

import numpy as np
import jax
import jax.numpy as jnp
from jax.experimental import pallas as pl
from jax.experimental.pallas import tpu as pltpu


# ----------------------------------------------------------------------------
# Host-side plan construction (deterministic, cached per shape/config).
# ----------------------------------------------------------------------------
def _adaptive_pool_matrix(in_size: int, out_size: int) -> np.ndarray:
    """P[i, j] = 1/len(bin_i) if j in bin_i else 0 (PyTorch adaptive-pool bins)."""
    P = np.zeros((out_size, in_size), dtype=np.float32)
    for i in range(out_size):
        start = (i * in_size) // out_size
        end = math.ceil((i + 1) * in_size / out_size)
        P[i, start:end] = 1.0 / float(end - start)
    return P


def _round_up(x: int, m: int) -> int:
    return ((x + m - 1) // m) * m


@functools.lru_cache(maxsize=None)
def _build_plan(sizes, d, h, w):
    """Returns (w_hw, stages, q_total, p_total, p_pad).

    w_hw   : jnp.float32 (h*w, q_total) — per-stage blocks, each padded to a
             multiple of 128 lanes; block for stage s = kron(Ph_s, Pw_s)^T.
    stages : tuple of (s, q_off, p_off, dbins); dbins[u] = ((d_idx, weight), ...)
             compile-time taps of the adaptive pool along depth.
    """
    hw = h * w
    blocks, stages = [], []
    q_off = 0
    p_off = 0
    for s in sizes:
        Ph = _adaptive_pool_matrix(h, s)
        Pw = _adaptive_pool_matrix(w, s)
        Pd = _adaptive_pool_matrix(d, s)
        ss = s * s
        q_pad = _round_up(ss, 128)
        blk = np.zeros((hw, q_pad), dtype=np.float32)
        blk[:, :ss] = np.kron(Ph, Pw).T                 # (h*w, s*s)
        blocks.append(blk)
        dbins = []
        for u in range(s):
            nz = np.nonzero(Pd[u])[0]
            dbins.append(tuple((int(dd), float(Pd[u, dd])) for dd in nz))
        stages.append((s, q_off, p_off, tuple(dbins)))
        q_off += q_pad
        p_off += s ** 3
    w_hw = jnp.asarray(np.concatenate(blocks, axis=1))  # (h*w, q_total), ~512 KB
    p_total = p_off
    p_pad = _round_up(max(p_total, 1), 128)
    return w_hw, tuple(stages), q_off, p_total, p_pad


# ----------------------------------------------------------------------------
# Pallas kernel: one MXU matmul for (h,w) pooling + unrolled constant-tap
# depth pooling, all in a single invocation (everything fits in VMEM).
# ----------------------------------------------------------------------------
def _make_kernel(nc, d, q_total, stages):
    def kernel(x_ref, w_ref, o_ref, a_ref):
        # x_ref: (d*nc, h*w)      input rows ordered (d, n*c)
        # w_ref: (h*w, q_total)   concatenated kron(Ph,Pw)^T stage blocks
        # o_ref: (nc, p_pad)      packed pyramid output (+ lane padding)
        # a_ref: (d, nc, q_total) VMEM scratch of (h,w)-pooled maps
        a = jnp.dot(x_ref[...], w_ref[...], preferred_element_type=jnp.float32)
        a_ref[...] = a.reshape(d, nc, q_total)

        # Depth pooling: each output row u of a stage is a short weighted sum
        # over its adaptive-pool d-bin (weights are compile-time constants).
        for (s, q_off, p_off, dbins) in stages:
            ss = s * s
            for u in range(s):
                acc = None
                for (dd, wgt) in dbins[u]:
                    term = wgt * a_ref[dd, :, q_off:q_off + ss]
                    acc = term if acc is None else acc + term
                o_ref[:, p_off + u * ss:p_off + (u + 1) * ss] = acc

    return kernel


def _pyramid_pool_call(x2, w_hw, nc, d, q_total, p_pad, stages):
    kernel = _make_kernel(nc, d, q_total, stages)
    return pl.pallas_call(
        kernel,
        out_shape=jax.ShapeDtypeStruct((nc, p_pad), jnp.float32),
        in_specs=[
            pl.BlockSpec(memory_space=pltpu.MemorySpace.VMEM),
            pl.BlockSpec(memory_space=pltpu.MemorySpace.VMEM),
        ],
        out_specs=pl.BlockSpec(memory_space=pltpu.MemorySpace.VMEM),
        scratch_shapes=[pltpu.VMEM((d, nc, q_total), jnp.float32)],
    )(x2, w_hw)


# ----------------------------------------------------------------------------
# Forward pass (mirrors pyramid_pooling.forward with dimension=3).
# ----------------------------------------------------------------------------
def pyramid_pooling_forward(feats: jax.Array, sizes=(1, 3, 6, 8)) -> jax.Array:
    n, c, d, h, w = feats.shape
    w_hw, stages, q_total, p_total, p_pad = _build_plan(tuple(sizes), d, h, w)
    # Layout plumbing in XLA: rows ordered (d, n*c) so the kernel only needs
    # leading-index reads of its scratch; pure reshape/transpose of ~128 KB.
    x2 = (
        jnp.transpose(feats, (2, 0, 1, 3, 4))
        .reshape(d * n * c, h * w)
        .astype(jnp.float32)
    )
    out = _pyramid_pool_call(x2, w_hw, n * c, d, q_total, p_pad, stages)
    return out[:, :p_total].reshape(n, c, p_total)


# ----------------------------------------------------------------------------
# Reference (pure numpy) for a correctness sanity check.
# ----------------------------------------------------------------------------
def _reference(feats_np: np.ndarray, sizes=(1, 3, 6, 8)) -> np.ndarray:
    n, c, d, h, w = feats_np.shape
    priors = []
    for s in sizes:
        Pd = _adaptive_pool_matrix(d, s)
        Ph = _adaptive_pool_matrix(h, s)
        Pw = _adaptive_pool_matrix(w, s)
        t = np.einsum('ncdhw,iw->ncdhi', feats_np, Pw)
        t = np.einsum('ncdhi,jh->ncdji', t, Ph)
        t = np.einsum('ncdji,kd->nckji', t, Pd)
        priors.append(t.reshape(n, c, -1))
    return np.concatenate(priors, axis=-1)


if __name__ == "__main__":
    key = jax.random.PRNGKey(0)
    # n=2, c=4, d=h=w=16  ->  output (2, 4, 1 + 27 + 216 + 512) = (2, 4, 756)
    feats = jax.random.normal(key, (2, 4, 16, 16, 16), dtype=jnp.float32)

    out = pyramid_pooling_forward(feats)
    out = jax.block_until_ready(out)

    ref = _reference(np.asarray(feats))
    assert out.shape == (2, 4, 756), out.shape
    np.testing.assert_allclose(np.asarray(out), ref, rtol=1e-4, atol=1e-4)

    print("KERNEL_OK")
</pallas_src>

<mosaic_0001>
module attributes {stable_mosaic.version = 11 : i64} {
  func.func @kernel(%arg0: memref<128x256xf32, #tpu.memory_space<vmem>>, %arg1: memref<256x512xf32, #tpu.memory_space<vmem>>, %arg2: memref<8x768xf32, #tpu.memory_space<vmem>>, %arg3: memref<16x8x512xf32, #tpu.memory_space<vmem>>) attributes {dimension_semantics = [], scalar_prefetch = 0 : i64, scratch_operands = 1 : i64, tpu.core_type = #tpu.core_type<tc>} {
    %c0 = arith.constant 0 : index
    %c0_0 = arith.constant 0 : index
    %0 = vector.load %arg0[%c0, %c0_0] : memref<128x256xf32, #tpu.memory_space<vmem>>, vector<128x256xf32>
    %c0_1 = arith.constant 0 : index
    %c0_2 = arith.constant 0 : index
    %1 = vector.load %arg1[%c0_1, %c0_2] : memref<256x512xf32, #tpu.memory_space<vmem>>, vector<256x512xf32>
    %cst = arith.constant dense<0.000000e+00> : vector<128x512xf32>
    %2 = tpu.matmul %0, %1, %cst {dimension_numbers = #tpu.dot_dimension_numbers<[1], [0], [0], [1], [0, 0, 1, 1], [], []>} : vector<128x256xf32>, vector<256x512xf32>, vector<128x512xf32> -> vector<128x512xf32>
    %3 = vector.shape_cast %2 : vector<128x512xf32> to vector<16x8x512xf32>
    %c0_3 = arith.constant 0 : index
    %c0_4 = arith.constant 0 : index
    %c0_5 = arith.constant 0 : index
    %4 = vector.load %arg3[%c0_3, %c0_4, %c0_5] : memref<16x8x512xf32, #tpu.memory_space<vmem>>, vector<16x8x512xf32>
    tpu.vector_store %arg3[%c0_3, %c0_4, %c0_5], %3 {strides = array<i32>} : memref<16x8x512xf32, #tpu.memory_space<vmem>>, vector<16x8x512xf32>,
    %c0_6 = arith.constant 0 : index
    %c0_7 = arith.constant 0 : index
    %c0_8 = arith.constant 0 : index
    %5 = vector.load %arg3[%c0_6, %c0_7, %c0_8] : memref<16x8x512xf32, #tpu.memory_space<vmem>>, vector<1x8x1xf32>
    %6 = vector.shape_cast %5 : vector<1x8x1xf32> to vector<8x1xf32>
    %cst_9 = arith.constant 6.250000e-02 : f32
    %7 = vector.broadcast %cst_9 : f32 to vector<8x1xf32>
    %8 = arith.mulf %7, %6 : vector<8x1xf32>
    %c1 = arith.constant 1 : index
    %c0_10 = arith.constant 0 : index
    %c0_11 = arith.constant 0 : index
    %9 = vector.load %arg3[%c1, %c0_10, %c0_11] : memref<16x8x512xf32, #tpu.memory_space<vmem>>, vector<1x8x1xf32>
    %10 = vector.shape_cast %9 : vector<1x8x1xf32> to vector<8x1xf32>
    %cst_12 = arith.constant 6.250000e-02 : f32
    %11 = vector.broadcast %cst_12 : f32 to vector<8x1xf32>
    %12 = arith.mulf %11, %10 : vector<8x1xf32>
    %13 = arith.addf %8, %12 : vector<8x1xf32>
    %c2 = arith.constant 2 : index
    %c0_13 = arith.constant 0 : index
    %c0_14 = arith.constant 0 : index
    %14 = vector.load %arg3[%c2, %c0_13, %c0_14] : memref<16x8x512xf32, #tpu.memory_space<vmem>>, vector<1x8x1xf32>
    %15 = vector.shape_cast %14 : vector<1x8x1xf32> to vector<8x1xf32>
    %cst_15 = arith.constant 6.250000e-02 : f32
    %16 = vector.broadcast %cst_15 : f32 to vector<8x1xf32>
    %17 = arith.mulf %16, %15 : vector<8x1xf32>
    %18 = arith.addf %13, %17 : vector<8x1xf32>
    %c3 = arith.constant 3 : index
    %c0_16 = arith.constant 0 : index
    %c0_17 = arith.constant 0 : index
    %19 = vector.load %arg3[%c3, %c0_16, %c0_17] : memref<16x8x512xf32, #tpu.memory_space<vmem>>, vector<1x8x1xf32>
    %20 = vector.shape_cast %19 : vector<1x8x1xf32> to vector<8x1xf32>
    %cst_18 = arith.constant 6.250000e-02 : f32
    %21 = vector.broadcast %cst_18 : f32 to vector<8x1xf32>
    %22 = arith.mulf %21, %20 : vector<8x1xf32>
    %23 = arith.addf %18, %22 : vector<8x1xf32>
    %c4 = arith.constant 4 : index
    %c0_19 = arith.constant 0 : index
    %c0_20 = arith.constant 0 : index
    %24 = vector.load %arg3[%c4, %c0_19, %c0_20] : memref<16x8x512xf32, #tpu.memory_space<vmem>>, vector<1x8x1xf32>
    %25 = vector.shape_cast %24 : vector<1x8x1xf32> to vector<8x1xf32>
    %cst_21 = arith.constant 6.250000e-02 : f32
    %26 = vector.broadcast %cst_21 : f32 to vector<8x1xf32>
    %27 = arith.mulf %26, %25 : vector<8x1xf32>
    %28 = arith.addf %23, %27 : vector<8x1xf32>
    %c5 = arith.constant 5 : index
    %c0_22 = arith.constant 0 : index
    %c0_23 = arith.constant 0 : index
    %29 = vector.load %arg3[%c5, %c0_22, %c0_23] : memref<16x8x512xf32, #tpu.memory_space<vmem>>, vector<1x8x1xf32>
    %30 = vector.shape_cast %29 : vector<1x8x1xf32> to vector<8x1xf32>
    %cst_24 = arith.constant 6.250000e-02 : f32
    %31 = vector.broadcast %cst_24 : f32 to vector<8x1xf32>
    %32 = arith.mulf %31, %30 : vector<8x1xf32>
    %33 = arith.addf %28, %32 : vector<8x1xf32>
    %c6 = arith.constant 6 : index
    %c0_25 = arith.constant 0 : index
    %c0_26 = arith.constant 0 : index
    %34 = vector.load %arg3[%c6, %c0_25, %c0_26] : memref<16x8x512xf32, #tpu.memory_space<vmem>>, vector<1x8x1xf32>
    %35 = vector.shape_cast %34 : vector<1x8x1xf32> to vector<8x1xf32>
    %cst_27 = arith.constant 6.250000e-02 : f32
    %36 = vector.broadcast %cst_27 : f32 to vector<8x1xf32>
    %37 = arith.mulf %36, %35 : vector<8x1xf32>
    %38 = arith.addf %33, %37 : vector<8x1xf32>
    %c7 = arith.constant 7 : index
    %c0_28 = arith.constant 0 : index
    %c0_29 = arith.constant 0 : index
    %39 = vector.load %arg3[%c7, %c0_28, %c0_29] : memref<16x8x512xf32, #tpu.memory_space<vmem>>, vector<1x8x1xf32>
    %40 = vector.shape_cast %39 : vector<1x8x1xf32> to vector<8x1xf32>
    %cst_30 = arith.constant 6.250000e-02 : f32
    %41 = vector.broadcast %cst_30 : f32 to vector<8x1xf32>
    %42 = arith.mulf %41, %40 : vector<8x1xf32>
    %43 = arith.addf %38, %42 : vector<8x1xf32>
    %c8 = arith.constant 8 : index
    %c0_31 = arith.constant 0 : index
    %c0_32 = arith.constant 0 : index
    %44 = vector.load %arg3[%c8, %c0_31, %c0_32] : memref<16x8x512xf32, #tpu.memory_space<vmem>>, vector<1x8x1xf32>
    %45 = vector.shape_cast %44 : vector<1x8x1xf32> to vector<8x1xf32>
    %cst_33 = arith.constant 6.250000e-02 : f32
    %46 = vector.broadcast %cst_33 : f32 to vector<8x1xf32>
    %47 = arith.mulf %46, %45 : vector<8x1xf32>
    %48 = arith.addf %43, %47 : vector<8x1xf32>
    %c9 = arith.constant 9 : index
    %c0_34 = arith.constant 0 : index
    %c0_35 = arith.constant 0 : index
    %49 = vector.load %arg3[%c9, %c0_34, %c0_35] : memref<16x8x512xf32, #tpu.memory_space<vmem>>, vector<1x8x1xf32>
    %50 = vector.shape_cast %49 : vector<1x8x1xf32> to vector<8x1xf32>
    %cst_36 = arith.constant 6.250000e-02 : f32
    %51 = vector.broadcast %cst_36 : f32 to vector<8x1xf32>
    %52 = arith.mulf %51, %50 : vector<8x1xf32>
    %53 = arith.addf %48, %52 : vector<8x1xf32>
    %c10 = arith.constant 10 : index
    %c0_37 = arith.constant 0 : index
    %c0_38 = arith.constant 0 : index
    %54 = vector.load %arg3[%c10, %c0_37, %c0_38] : memref<16x8x512xf32, #tpu.memory_space<vmem>>, vector<1x8x1xf32>
    %55 = vector.shape_cast %54 : vector<1x8x1xf32> to vector<8x1xf32>
    %cst_39 = arith.constant 6.250000e-02 : f32
    %56 = vector.broadcast %cst_39 : f32 to vector<8x1xf32>
    %57 = arith.mulf %56, %55 : vector<8x1xf32>
    %58 = arith.addf %53, %57 : vector<8x1xf32>
    %c11 = arith.constant 11 : index
    %c0_40 = arith.constant 0 : index
    %c0_41 = arith.constant 0 : index
    %59 = vector.load %arg3[%c11, %c0_40, %c0_41] : memref<16x8x512xf32, #tpu.memory_space<vmem>>, vector<1x8x1xf32>
    %60 = vector.shape_cast %59 : vector<1x8x1xf32> to vector<8x1xf32>
    %cst_42 = arith.constant 6.250000e-02 : f32
    %61 = vector.broadcast %cst_42 : f32 to vector<8x1xf32>
    %62 = arith.mulf %61, %60 : vector<8x1xf32>
    %63 = arith.addf %58, %62 : vector<8x1xf32>
    %c12 = arith.constant 12 : index
    %c0_43 = arith.constant 0 : index
    %c0_44 = arith.constant 0 : index
    %64 = vector.load %arg3[%c12, %c0_43, %c0_44] : memref<16x8x512xf32, #tpu.memory_space<vmem>>, vector<1x8x1xf32>
    %65 = vector.shape_cast %64 : vector<1x8x1xf32> to vector<8x1xf32>
    %cst_45 = arith.constant 6.250000e-02 : f32
    %66 = vector.broadcast %cst_45 : f32 to vector<8x1xf32>
    %67 = arith.mulf %66, %65 : vector<8x1xf32>
    %68 = arith.addf %63, %67 : vector<8x1xf32>
    %c13 = arith.constant 13 : index
    %c0_46 = arith.constant 0 : index
    %c0_47 = arith.constant 0 : index
    %69 = vector.load %arg3[%c13, %c0_46, %c0_47] : memref<16x8x512xf32, #tpu.memory_space<vmem>>, vector<1x8x1xf32>
    %70 = vector.shape_cast %69 : vector<1x8x1xf32> to vector<8x1xf32>
    %cst_48 = arith.constant 6.250000e-02 : f32
    %71 = vector.broadcast %cst_48 : f32 to vector<8x1xf32>
    %72 = arith.mulf %71, %70 : vector<8x1xf32>
    %73 = arith.addf %68, %72 : vector<8x1xf32>
    %c14 = arith.constant 14 : index
    %c0_49 = arith.constant 0 : index
    %c0_50 = arith.constant 0 : index
    %74 = vector.load %arg3[%c14, %c0_49, %c0_50] : memref<16x8x512xf32, #tpu.memory_space<vmem>>, vector<1x8x1xf32>
    %75 = vector.shape_cast %74 : vector<1x8x1xf32> to vector<8x1xf32>
    %cst_51 = arith.constant 6.250000e-02 : f32
    %76 = vector.broadcast %cst_51 : f32 to vector<8x1xf32>
    %77 = arith.mulf %76, %75 : vector<8x1xf32>
    %78 = arith.addf %73, %77 : vector<8x1xf32>
    %c15 = arith.constant 15 : index
    %c0_52 = arith.constant 0 : index
    %c0_53 = arith.constant 0 : index
    %79 = vector.load %arg3[%c15, %c0_52, %c0_53] : memref<16x8x512xf32, #tpu.memory_space<vmem>>, vector<1x8x1xf32>
    %80 = vector.shape_cast %79 : vector<1x8x1xf32> to vector<8x1xf32>
    %cst_54 = arith.constant 6.250000e-02 : f32
    %81 = vector.broadcast %cst_54 : f32 to vector<8x1xf32>
    %82 = arith.mulf %81, %80 : vector<8x1xf32>
    %83 = arith.addf %78, %82 : vector<8x1xf32>
    %c0_55 = arith.constant 0 : index
    %c0_56 = arith.constant 0 : index
    %84 = vector.load %arg2[%c0_55, %c0_56] : memref<8x768xf32, #tpu.memory_space<vmem>>, vector<8x1xf32>
    tpu.vector_store %arg2[%c0_55, %c0_56], %83 {strides = array<i32>} : memref<8x768xf32, #tpu.memory_space<vmem>>, vector<8x1xf32>,
    %c0_57 = arith.constant 0 : index
    %c0_58 = arith.constant 0 : index
    %c128 = arith.constant 128 : index
    %85 = vector.load %arg3[%c0_57, %c0_58, %c128] : memref<16x8x512xf32, #tpu.memory_space<vmem>>, vector<1x8x9xf32>
    %86 = vector.shape_cast %85 : vector<1x8x9xf32> to vector<8x9xf32>
    %cst_59 = arith.constant 0.166666672 : f32
    %87 = vector.broadcast %cst_59 : f32 to vector<8x9xf32>
    %88 = arith.mulf %87, %86 : vector<8x9xf32>
    %c1_60 = arith.constant 1 : index
    %c0_61 = arith.constant 0 : index
    %c128_62 = arith.constant 128 : index
    %89 = vector.load %arg3[%c1_60, %c0_61, %c128_62] : memref<16x8x512xf32, #tpu.memory_space<vmem>>, vector<1x8x9xf32>
    %90 = vector.shape_cast %89 : vector<1x8x9xf32> to vector<8x9xf32>
    %cst_63 = arith.constant 0.166666672 : f32
    %91 = vector.broadcast %cst_63 : f32 to vector<8x9xf32>
    %92 = arith.mulf %91, %90 : vector<8x9xf32>
    %93 = arith.addf %88, %92 : vector<8x9xf32>
    %c2_64 = arith.constant 2 : index
    %c0_65 = arith.constant 0 : index
    %c128_66 = arith.constant 128 : index
    %94 = vector.load %arg3[%c2_64, %c0_65, %c128_66] : memref<16x8x512xf32, #tpu.memory_space<vmem>>, vector<1x8x9xf32>
    %95 = vector.shape_cast %94 : vector<1x8x9xf32> to vector<8x9xf32>
    %cst_67 = arith.constant 0.166666672 : f32
    %96 = vector.broadcast %cst_67 : f32 to vector<8x9xf32>
    %97 = arith.mulf %96, %95 : vector<8x9xf32>
    %98 = arith.addf %93, %97 : vector<8x9xf32>
    %c3_68 = arith.constant 3 : index
    %c0_69 = arith.constant 0 : index
    %c128_70 = arith.constant 128 : index
    %99 = vector.load %arg3[%c3_68, %c0_69, %c128_70] : memref<16x8x512xf32, #tpu.memory_space<vmem>>, vector<1x8x9xf32>
    %100 = vector.shape_cast %99 : vector<1x8x9xf32> to vector<8x9xf32>
    %cst_71 = arith.constant 0.166666672 : f32
    %101 = vector.broadcast %cst_71 : f32 to vector<8x9xf32>
    %102 = arith.mulf %101, %100 : vector<8x9xf32>
    %103 = arith.addf %98, %102 : vector<8x9xf32>
    %c4_72 = arith.constant 4 : index
    %c0_73 = arith.constant 0 : index
    %c128_74 = arith.constant 128 : index
    %104 = vector.load %arg3[%c4_72, %c0_73, %c128_74] : memref<16x8x512xf32, #tpu.memory_space<vmem>>, vector<1x8x9xf32>
    %105 = vector.shape_cast %104 : vector<1x8x9xf32> to vector<8x9xf32>
    %cst_75 = arith.constant 0.166666672 : f32
    %106 = vector.broadcast %cst_75 : f32 to vector<8x9xf32>
    %107 = arith.mulf %106, %105 : vector<8x9xf32>
    %108 = arith.addf %103, %107 : vector<8x9xf32>
    %c5_76 = arith.constant 5 : index
    %c0_77 = arith.constant 0 : index
    %c128_78 = arith.constant 128 : index
    %109 = vector.load %arg3[%c5_76, %c0_77, %c128_78] : memref<16x8x512xf32, #tpu.memory_space<vmem>>, vector<1x8x9xf32>
    %110 = vector.shape_cast %109 : vector<1x8x9xf32> to vector<8x9xf32>
    %cst_79 = arith.constant 0.166666672 : f32
    %111 = vector.broadcast %cst_79 : f32 to vector<8x9xf32>
    %112 = arith.mulf %111, %110 : vector<8x9xf32>
    %113 = arith.addf %108, %112 : vector<8x9xf32>
    %c0_80 = arith.constant 0 : index
    %c1_81 = arith.constant 1 : index
    %114 = vector.load %arg2[%c0_80, %c1_81] : memref<8x768xf32, #tpu.memory_space<vmem>>, vector<8x9xf32>
    tpu.vector_store %arg2[%c0_80, %c1_81], %113 {strides = array<i32>} : memref<8x768xf32, #tpu.memory_space<vmem>>, vector<8x9xf32>,
    %c5_82 = arith.constant 5 : index
    %c0_83 = arith.constant 0 : index
    %c128_84 = arith.constant 128 : index
    %115 = vector.load %arg3[%c5_82, %c0_83, %c128_84] : memref<16x8x512xf32, #tpu.memory_space<vmem>>, vector<1x8x9xf32>
    %116 = vector.shape_cast %115 : vector<1x8x9xf32> to vector<8x9xf32>
    %cst_85 = arith.constant 0.166666672 : f32
    %117 = vector.broadcast %cst_85 : f32 to vector<8x9xf32>
    %118 = arith.mulf %117, %116 : vector<8x9xf32>
    %c6_86 = arith.constant 6 : index
    %c0_87 = arith.constant 0 : index
    %c128_88 = arith.constant 128 : index
    %119 = vector.load %arg3[%c6_86, %c0_87, %c128_88] : memref<16x8x512xf32, #tpu.memory_space<vmem>>, vector<1x8x9xf32>
    %120 = vector.shape_cast %119 : vector<1x8x9xf32> to vector<8x9xf32>
    %cst_89 = arith.constant 0.166666672 : f32
    %121 = vector.broadcast %cst_89 : f32 to vector<8x9xf32>
    %122 = arith.mulf %121, %120 : vector<8x9xf32>
    %123 = arith.addf %118, %122 : vector<8x9xf32>
    %c7_90 = arith.constant 7 : index
    %c0_91 = arith.constant 0 : index
    %c128_92 = arith.constant 128 : index
    %124 = vector.load %arg3[%c7_90, %c0_91, %c128_92] : memref<16x8x512xf32, #tpu.memory_space<vmem>>, vector<1x8x9xf32>
    %125 = vector.shape_cast %124 : vector<1x8x9xf32> to vector<8x9xf32>
    %cst_93 = arith.constant 0.166666672 : f32
    %126 = vector.broadcast %cst_93 : f32 to vector<8x9xf32>
    %127 = arith.mulf %126, %125 : vector<8x9xf32>
    %128 = arith.addf %123, %127 : vector<8x9xf32>
    %c8_94 = arith.constant 8 : index
    %c0_95 = arith.constant 0 : index
    %c128_96 = arith.constant 128 : index
    %129 = vector.load %arg3[%c8_94, %c0_95, %c128_96] : memref<16x8x512xf32, #tpu.memory_space<vmem>>, vector<1x8x9xf32>
    %130 = vector.shape_cast %129 : vector<1x8x9xf32> to vector<8x9xf32>
    %cst_97 = arith.constant 0.166666672 : f32
    %131 = vector.broadcast %cst_97 : f32 to vector<8x9xf32>
    %132 = arith.mulf %131, %130 : vector<8x9xf32>
    %133 = arith.addf %128, %132 : vector<8x9xf32>
    %c9_98 = arith.constant 9 : index
    %c0_99 = arith.constant 0 : index
    %c128_100 = arith.constant 128 : index
    %134 = vector.load %arg3[%c9_98, %c0_99, %c128_100] : memref<16x8x512xf32, #tpu.memory_space<vmem>>, vector<1x8x9xf32>
    %135 = vector.shape_cast %134 : vector<1x8x9xf32> to vector<8x9xf32>
    %cst_101 = arith.constant 0.166666672 : f32
    %136 = vector.broadcast %cst_101 : f32 to vector<8x9xf32>
    %137 = arith.mulf %136, %135 : vector<8x9xf32>
    %138 = arith.addf %133, %137 : vector<8x9xf32>
    %c10_102 = arith.constant 10 : index
    %c0_103 = arith.constant 0 : index
    %c128_104 = arith.constant 128 : index
    %139 = vector.load %arg3[%c10_102, %c0_103, %c128_104] : memref<16x8x512xf32, #tpu.memory_space<vmem>>, vector<1x8x9xf32>
    %140 = vector.shape_cast %139 : vector<1x8x9xf32> to vector<8x9xf32>
    %cst_105 = arith.constant 0.166666672 : f32
    %141 = vector.broadcast %cst_105 : f32 to vector<8x9xf32>
    %142 = arith.mulf %141, %140 : vector<8x9xf32>
    %143 = arith.addf %138, %142 : vector<8x9xf32>
    %c0_106 = arith.constant 0 : index
    %c10_107 = arith.constant 10 : index
    %144 = vector.load %arg2[%c0_106, %c10_107] : memref<8x768xf32, #tpu.memory_space<vmem>>, vector<8x9xf32>
    tpu.vector_store %arg2[%c0_106, %c10_107], %143 {strides = array<i32>} : memref<8x768xf32, #tpu.memory_space<vmem>>, vector<8x9xf32>,
    %c10_108 = arith.constant 10 : index
    %c0_109 = arith.constant 0 : index
    %c128_110 = arith.constant 128 : index
    %145 = vector.load %arg3[%c10_108, %c0_109, %c128_110] : memref<16x8x512xf32, #tpu.memory_space<vmem>>, vector<1x8x9xf32>
    %146 = vector.shape_cast %145 : vector<1x8x9xf32> to vector<8x9xf32>
    %cst_111 = arith.constant 0.166666672 : f32
    %147 = vector.broadcast %cst_111 : f32 to vector<8x9xf32>
    %148 = arith.mulf %147, %146 : vector<8x9xf32>
    %c11_112 = arith.constant 11 : index
    %c0_113 = arith.constant 0 : index
    %c128_114 = arith.constant 128 : index
    %149 = vector.load %arg3[%c11_112, %c0_113, %c128_114] : memref<16x8x512xf32, #tpu.memory_space<vmem>>, vector<1x8x9xf32>
    %150 = vector.shape_cast %149 : vector<1x8x9xf32> to vector<8x9xf32>
    %cst_115 = arith.constant 0.166666672 : f32
    %151 = vector.broadcast %cst_115 : f32 to vector<8x9xf32>
    %152 = arith.mulf %151, %150 : vector<8x9xf32>
    %153 = arith.addf %148, %152 : vector<8x9xf32>
    %c12_116 = arith.constant 12 : index
    %c0_117 = arith.constant 0 : index
    %c128_118 = arith.constant 128 : index
    %154 = vector.load %arg3[%c12_116, %c0_117, %c128_118] : memref<16x8x512xf32, #tpu.memory_space<vmem>>, vector<1x8x9xf32>
    %155 = vector.shape_cast %154 : vector<1x8x9xf32> to vector<8x9xf32>
    %cst_119 = arith.constant 0.166666672 : f32
    %156 = vector.broadcast %cst_119 : f32 to vector<8x9xf32>
    %157 = arith.mulf %156, %155 : vector<8x9xf32>
    %158 = arith.addf %153, %157 : vector<8x9xf32>
    %c13_120 = arith.constant 13 : index
    %c0_121 = arith.constant 0 : index
    %c128_122 = arith.constant 128 : index
    %159 = vector.load %arg3[%c13_120, %c0_121, %c128_122] : memref<16x8x512xf32, #tpu.memory_space<vmem>>, vector<1x8x9xf32>
    %160 = vector.shape_cast %159 : vector<1x8x9xf32> to vector<8x9xf32>
    %cst_123 = arith.constant 0.166666672 : f32
    %161 = vector.broadcast %cst_123 : f32 to vector<8x9xf32>
    %162 = arith.mulf %161, %160 : vector<8x9xf32>
    %163 = arith.addf %158, %162 : vector<8x9xf32>
    %c14_124 = arith.constant 14 : index
    %c0_125 = arith.constant 0 : index
    %c128_126 = arith.constant 128 : index
    %164 = vector.load %arg3[%c14_124, %c0_125, %c128_126] : memref<16x8x512xf32, #tpu.memory_space<vmem>>, vector<1x8x9xf32>
    %165 = vector.shape_cast %164 : vector<1x8x9xf32> to vector<8x9xf32>
    %cst_127 = arith.constant 0.166666672 : f32
    %166 = vector.broadcast %cst_127 : f32 to vector<8x9xf32>
    %167 = arith.mulf %166, %165 : vector<8x9xf32>
    %168 = arith.addf %163, %167 : vector<8x9xf32>
    %c15_128 = arith.constant 15 : index
    %c0_129 = arith.constant 0 : index
    %c128_130 = arith.constant 128 : index
    %169 = vector.load %arg3[%c15_128, %c0_129, %c128_130] : memref<16x8x512xf32, #tpu.memory_space<vmem>>, vector<1x8x9xf32>
    %170 = vector.shape_cast %169 : vector<1x8x9xf32> to vector<8x9xf32>
    %cst_131 = arith.constant 0.166666672 : f32
    %171 = vector.broadcast %cst_131 : f32 to vector<8x9xf32>
    %172 = arith.mulf %171, %170 : vector<8x9xf32>
    %173 = arith.addf %168, %172 : vector<8x9xf32>
    %c0_132 = arith.constant 0 : index
    %c19 = arith.constant 19 : index
    %174 = vector.load %arg2[%c0_132, %c19] : memref<8x768xf32, #tpu.memory_space<vmem>>, vector<8x9xf32>
    tpu.vector_store %arg2[%c0_132, %c19], %173 {strides = array<i32>} : memref<8x768xf32, #tpu.memory_space<vmem>>, vector<8x9xf32>,
    %c0_133 = arith.constant 0 : index
    %c0_134 = arith.constant 0 : index
    %c256 = arith.constant 256 : index
    %175 = vector.load %arg3[%c0_133, %c0_134, %c256] : memref<16x8x512xf32, #tpu.memory_space<vmem>>, vector<1x8x36xf32>
    %176 = vector.shape_cast %175 : vector<1x8x36xf32> to vector<8x36xf32>
    %cst_135 = arith.constant 0.333333343 : f32
    %177 = vector.broadcast %cst_135 : f32 to vector<8x36xf32>
    %178 = arith.mulf %177, %176 : vector<8x36xf32>
    %c1_136 = arith.constant 1 : index
    %c0_137 = arith.constant 0 : index
    %c256_138 = arith.constant 256 : index
    %179 = vector.load %arg3[%c1_136, %c0_137, %c256_138] : memref<16x8x512xf32, #tpu.memory_space<vmem>>, vector<1x8x36xf32>
    %180 = vector.shape_cast %179 : vector<1x8x36xf32> to vector<8x36xf32>
    %cst_139 = arith.constant 0.333333343 : f32
    %181 = vector.broadcast %cst_139 : f32 to vector<8x36xf32>
    %182 = arith.mulf %181, %180 : vector<8x36xf32>
    %183 = arith.addf %178, %182 : vector<8x36xf32>
    %c2_140 = arith.constant 2 : index
    %c0_141 = arith.constant 0 : index
    %c256_142 = arith.constant 256 : index
    %184 = vector.load %arg3[%c2_140, %c0_141, %c256_142] : memref<16x8x512xf32, #tpu.memory_space<vmem>>, vector<1x8x36xf32>
    %185 = vector.shape_cast %184 : vector<1x8x36xf32> to vector<8x36xf32>
    %cst_143 = arith.constant 0.333333343 : f32
    %186 = vector.broadcast %cst_143 : f32 to vector<8x36xf32>
    %187 = arith.mulf %186, %185 : vector<8x36xf32>
    %188 = arith.addf %183, %187 : vector<8x36xf32>
    %c0_144 = arith.constant 0 : index
    %c28 = arith.constant 28 : index
    %189 = vector.load %arg2[%c0_144, %c28] : memref<8x768xf32, #tpu.memory_space<vmem>>, vector<8x36xf32>
    tpu.vector_store %arg2[%c0_144, %c28], %188 {strides = array<i32>} : memref<8x768xf32, #tpu.memory_space<vmem>>, vector<8x36xf32>,
    %c2_145 = arith.constant 2 : index
    %c0_146 = arith.constant 0 : index
    %c256_147 = arith.constant 256 : index
    %190 = vector.load %arg3[%c2_145, %c0_146, %c256_147] : memref<16x8x512xf32, #tpu.memory_space<vmem>>, vector<1x8x36xf32>
    %191 = vector.shape_cast %190 : vector<1x8x36xf32> to vector<8x36xf32>
    %cst_148 = arith.constant 2.500000e-01 : f32
    %192 = vector.broadcast %cst_148 : f32 to vector<8x36xf32>
    %193 = arith.mulf %192, %191 : vector<8x36xf32>
    %c3_149 = arith.constant 3 : index
    %c0_150 = arith.constant 0 : index
    %c256_151 = arith.constant 256 : index
    %194 = vector.load %arg3[%c3_149, %c0_150, %c256_151] : memref<16x8x512xf32, #tpu.memory_space<vmem>>, vector<1x8x36xf32>
    %195 = vector.shape_cast %194 : vector<1x8x36xf32> to vector<8x36xf32>
    %cst_152 = arith.constant 2.500000e-01 : f32
    %196 = vector.broadcast %cst_152 : f32 to vector<8x36xf32>
    %197 = arith.mulf %196, %195 : vector<8x36xf32>
    %198 = arith.addf %193, %197 : vector<8x36xf32>
    %c4_153 = arith.constant 4 : index
    %c0_154 = arith.constant 0 : index
    %c256_155 = arith.constant 256 : index
    %199 = vector.load %arg3[%c4_153, %c0_154, %c256_155] : memref<16x8x512xf32, #tpu.memory_space<vmem>>, vector<1x8x36xf32>
    %200 = vector.shape_cast %199 : vector<1x8x36xf32> to vector<8x36xf32>
    %cst_156 = arith.constant 2.500000e-01 : f32
    %201 = vector.broadcast %cst_156 : f32 to vector<8x36xf32>
    %202 = arith.mulf %201, %200 : vector<8x36xf32>
    %203 = arith.addf %198, %202 : vector<8x36xf32>
    %c5_157 = arith.constant 5 : index
    %c0_158 = arith.constant 0 : index
    %c256_159 = arith.constant 256 : index
    %204 = vector.load %arg3[%c5_157, %c0_158, %c256_159] : memref<16x8x512xf32, #tpu.memory_space<vmem>>, vector<1x8x36xf32>
    %205 = vector.shape_cast %204 : vector<1x8x36xf32> to vector<8x36xf32>
    %cst_160 = arith.constant 2.500000e-01 : f32
    %206 = vector.broadcast %cst_160 : f32 to vector<8x36xf32>
    %207 = arith.mulf %206, %205 : vector<8x36xf32>
    %208 = arith.addf %203, %207 : vector<8x36xf32>
    %c0_161 = arith.constant 0 : index
    %c64 = arith.constant 64 : index
    %209 = vector.load %arg2[%c0_161, %c64] : memref<8x768xf32, #tpu.memory_space<vmem>>, vector<8x36xf32>
    tpu.vector_store %arg2[%c0_161, %c64], %208 {strides = array<i32>} : memref<8x768xf32, #tpu.memory_space<vmem>>, vector<8x36xf32>,
    %c5_162 = arith.constant 5 : index
    %c0_163 = arith.constant 0 : index
    %c256_164 = arith.constant 256 : index
    %210 = vector.load %arg3[%c5_162, %c0_163, %c256_164] : memref<16x8x512xf32, #tpu.memory_space<vmem>>, vector<1x8x36xf32>
    %211 = vector.shape_cast %210 : vector<1x8x36xf32> to vector<8x36xf32>
    %cst_165 = arith.constant 0.333333343 : f32
    %212 = vector.broadcast %cst_165 : f32 to vector<8x36xf32>
    %213 = arith.mulf %212, %211 : vector<8x36xf32>
    %c6_166 = arith.constant 6 : index
    %c0_167 = arith.constant 0 : index
    %c256_168 = arith.constant 256 : index
    %214 = vector.load %arg3[%c6_166, %c0_167, %c256_168] : memref<16x8x512xf32, #tpu.memory_space<vmem>>, vector<1x8x36xf32>
    %215 = vector.shape_cast %214 : vector<1x8x36xf32> to vector<8x36xf32>
    %cst_169 = arith.constant 0.333333343 : f32
    %216 = vector.broadcast %cst_169 : f32 to vector<8x36xf32>
    %217 = arith.mulf %216, %215 : vector<8x36xf32>
    %218 = arith.addf %213, %217 : vector<8x36xf32>
    %c7_170 = arith.constant 7 : index
    %c0_171 = arith.constant 0 : index
    %c256_172 = arith.constant 256 : index
    %219 = vector.load %arg3[%c7_170, %c0_171, %c256_172] : memref<16x8x512xf32, #tpu.memory_space<vmem>>, vector<1x8x36xf32>
    %220 = vector.shape_cast %219 : vector<1x8x36xf32> to vector<8x36xf32>
    %cst_173 = arith.constant 0.333333343 : f32
    %221 = vector.broadcast %cst_173 : f32 to vector<8x36xf32>
    %222 = arith.mulf %221, %220 : vector<8x36xf32>
    %223 = arith.addf %218, %222 : vector<8x36xf32>
    %c0_174 = arith.constant 0 : index
    %c100 = arith.constant 100 : index
    %224 = vector.load %arg2[%c0_174, %c100] : memref<8x768xf32, #tpu.memory_space<vmem>>, vector<8x36xf32>
    tpu.vector_store %arg2[%c0_174, %c100], %223 {strides = array<i32>} : memref<8x768xf32, #tpu.memory_space<vmem>>, vector<8x36xf32>,
    %c8_175 = arith.constant 8 : index
    %c0_176 = arith.constant 0 : index
    %c256_177 = arith.constant 256 : index
    %225 = vector.load %arg3[%c8_175, %c0_176, %c256_177] : memref<16x8x512xf32, #tpu.memory_space<vmem>>, vector<1x8x36xf32>
    %226 = vector.shape_cast %225 : vector<1x8x36xf32> to vector<8x36xf32>
    %cst_178 = arith.constant 0.333333343 : f32
    %227 = vector.broadcast %cst_178 : f32 to vector<8x36xf32>
    %228 = arith.mulf %227, %226 : vector<8x36xf32>
    %c9_179 = arith.constant 9 : index
    %c0_180 = arith.constant 0 : index
    %c256_181 = arith.constant 256 : index
    %229 = vector.load %arg3[%c9_179, %c0_180, %c256_181] : memref<16x8x512xf32, #tpu.memory_space<vmem>>, vector<1x8x36xf32>
    %230 = vector.shape_cast %229 : vector<1x8x36xf32> to vector<8x36xf32>
    %cst_182 = arith.constant 0.333333343 : f32
    %231 = vector.broadcast %cst_182 : f32 to vector<8x36xf32>
    %232 = arith.mulf %231, %230 : vector<8x36xf32>
    %233 = arith.addf %228, %232 : vector<8x36xf32>
    %c10_183 = arith.constant 10 : index
    %c0_184 = arith.constant 0 : index
    %c256_185 = arith.constant 256 : index
    %234 = vector.load %arg3[%c10_183, %c0_184, %c256_185] : memref<16x8x512xf32, #tpu.memory_space<vmem>>, vector<1x8x36xf32>
    %235 = vector.shape_cast %234 : vector<1x8x36xf32> to vector<8x36xf32>
    %cst_186 = arith.constant 0.333333343 : f32
    %236 = vector.broadcast %cst_186 : f32 to vector<8x36xf32>
    %237 = arith.mulf %236, %235 : vector<8x36xf32>
    %238 = arith.addf %233, %237 : vector<8x36xf32>
    %c0_187 = arith.constant 0 : index
    %c136 = arith.constant 136 : index
    %239 = vector.load %arg2[%c0_187, %c136] : memref<8x768xf32, #tpu.memory_space<vmem>>, vector<8x36xf32>
    tpu.vector_store %arg2[%c0_187, %c136], %238 {strides = array<i32>} : memref<8x768xf32, #tpu.memory_space<vmem>>, vector<8x36xf32>,
    %c10_188 = arith.constant 10 : index
    %c0_189 = arith.constant 0 : index
    %c256_190 = arith.constant 256 : index
    %240 = vector.load %arg3[%c10_188, %c0_189, %c256_190] : memref<16x8x512xf32, #tpu.memory_space<vmem>>, vector<1x8x36xf32>
    %241 = vector.shape_cast %240 : vector<1x8x36xf32> to vector<8x36xf32>
    %cst_191 = arith.constant 2.500000e-01 : f32
    %242 = vector.broadcast %cst_191 : f32 to vector<8x36xf32>
    %243 = arith.mulf %242, %241 : vector<8x36xf32>
    %c11_192 = arith.constant 11 : index
    %c0_193 = arith.constant 0 : index
    %c256_194 = arith.constant 256 : index
    %244 = vector.load %arg3[%c11_192, %c0_193, %c256_194] : memref<16x8x512xf32, #tpu.memory_space<vmem>>, vector<1x8x36xf32>
    %245 = vector.shape_cast %244 : vector<1x8x36xf32> to vector<8x36xf32>
    %cst_195 = arith.constant 2.500000e-01 : f32
    %246 = vector.broadcast %cst_195 : f32 to vector<8x36xf32>
    %247 = arith.mulf %246, %245 : vector<8x36xf32>
    %248 = arith.addf %243, %247 : vector<8x36xf32>
    %c12_196 = arith.constant 12 : index
    %c0_197 = arith.constant 0 : index
    %c256_198 = arith.constant 256 : index
    %249 = vector.load %arg3[%c12_196, %c0_197, %c256_198] : memref<16x8x512xf32, #tpu.memory_space<vmem>>, vector<1x8x36xf32>
    %250 = vector.shape_cast %249 : vector<1x8x36xf32> to vector<8x36xf32>
    %cst_199 = arith.constant 2.500000e-01 : f32
    %251 = vector.broadcast %cst_199 : f32 to vector<8x36xf32>
    %252 = arith.mulf %251, %250 : vector<8x36xf32>
    %253 = arith.addf %248, %252 : vector<8x36xf32>
    %c13_200 = arith.constant 13 : index
    %c0_201 = arith.constant 0 : index
    %c256_202 = arith.constant 256 : index
    %254 = vector.load %arg3[%c13_200, %c0_201, %c256_202] : memref<16x8x512xf32, #tpu.memory_space<vmem>>, vector<1x8x36xf32>
    %255 = vector.shape_cast %254 : vector<1x8x36xf32> to vector<8x36xf32>
    %cst_203 = arith.constant 2.500000e-01 : f32
    %256 = vector.broadcast %cst_203 : f32 to vector<8x36xf32>
    %257 = arith.mulf %256, %255 : vector<8x36xf32>
    %258 = arith.addf %253, %257 : vector<8x36xf32>
    %c0_204 = arith.constant 0 : index
    %c172 = arith.constant 172 : index
    %259 = vector.load %arg2[%c0_204, %c172] : memref<8x768xf32, #tpu.memory_space<vmem>>, vector<8x36xf32>
    tpu.vector_store %arg2[%c0_204, %c172], %258 {strides = array<i32>} : memref<8x768xf32, #tpu.memory_space<vmem>>, vector<8x36xf32>,
    %c13_205 = arith.constant 13 : index
    %c0_206 = arith.constant 0 : index
    %c256_207 = arith.constant 256 : index
    %260 = vector.load %arg3[%c13_205, %c0_206, %c256_207] : memref<16x8x512xf32, #tpu.memory_space<vmem>>, vector<1x8x36xf32>
    %261 = vector.shape_cast %260 : vector<1x8x36xf32> to vector<8x36xf32>
    %cst_208 = arith.constant 0.333333343 : f32
    %262 = vector.broadcast %cst_208 : f32 to vector<8x36xf32>
    %263 = arith.mulf %262, %261 : vector<8x36xf32>
    %c14_209 = arith.constant 14 : index
    %c0_210 = arith.constant 0 : index
    %c256_211 = arith.constant 256 : index
    %264 = vector.load %arg3[%c14_209, %c0_210, %c256_211] : memref<16x8x512xf32, #tpu.memory_space<vmem>>, vector<1x8x36xf32>
    %265 = vector.shape_cast %264 : vector<1x8x36xf32> to vector<8x36xf32>
    %cst_212 = arith.constant 0.333333343 : f32
    %266 = vector.broadcast %cst_212 : f32 to vector<8x36xf32>
    %267 = arith.mulf %266, %265 : vector<8x36xf32>
    %268 = arith.addf %263, %267 : vector<8x36xf32>
    %c15_213 = arith.constant 15 : index
    %c0_214 = arith.constant 0 : index
    %c256_215 = arith.constant 256 : index
    %269 = vector.load %arg3[%c15_213, %c0_214, %c256_215] : memref<16x8x512xf32, #tpu.memory_space<vmem>>, vector<1x8x36xf32>
    %270 = vector.shape_cast %269 : vector<1x8x36xf32> to vector<8x36xf32>
    %cst_216 = arith.constant 0.333333343 : f32
    %271 = vector.broadcast %cst_216 : f32 to vector<8x36xf32>
    %272 = arith.mulf %271, %270 : vector<8x36xf32>
    %273 = arith.addf %268, %272 : vector<8x36xf32>
    %c0_217 = arith.constant 0 : index
    %c208 = arith.constant 208 : index
    %274 = vector.load %arg2[%c0_217, %c208] : memref<8x768xf32, #tpu.memory_space<vmem>>, vector<8x36xf32>
    tpu.vector_store %arg2[%c0_217, %c208], %273 {strides = array<i32>} : memref<8x768xf32, #tpu.memory_space<vmem>>, vector<8x36xf32>,
    %c0_218 = arith.constant 0 : index
    %c0_219 = arith.constant 0 : index
    %c384 = arith.constant 384 : index
    %275 = vector.load %arg3[%c0_218, %c0_219, %c384] : memref<16x8x512xf32, #tpu.memory_space<vmem>>, vector<1x8x64xf32>
    %276 = vector.shape_cast %275 : vector<1x8x64xf32> to vector<8x64xf32>
    %cst_220 = arith.constant 5.000000e-01 : f32
    %277 = vector.broadcast %cst_220 : f32 to vector<8x64xf32>
    %278 = arith.mulf %277, %276 : vector<8x64xf32>
    %c1_221 = arith.constant 1 : index
    %c0_222 = arith.constant 0 : index
    %c384_223 = arith.constant 384 : index
    %279 = vector.load %arg3[%c1_221, %c0_222, %c384_223] : memref<16x8x512xf32, #tpu.memory_space<vmem>>, vector<1x8x64xf32>
    %280 = vector.shape_cast %279 : vector<1x8x64xf32> to vector<8x64xf32>
    %cst_224 = arith.constant 5.000000e-01 : f32
    %281 = vector.broadcast %cst_224 : f32 to vector<8x64xf32>
    %282 = arith.mulf %281, %280 : vector<8x64xf32>
    %283 = arith.addf %278, %282 : vector<8x64xf32>
    %c0_225 = arith.constant 0 : index
    %c244 = arith.constant 244 : index
    %284 = vector.load %arg2[%c0_225, %c244] : memref<8x768xf32, #tpu.memory_space<vmem>>, vector<8x64xf32>
    tpu.vector_store %arg2[%c0_225, %c244], %283 {strides = array<i32>} : memref<8x768xf32, #tpu.memory_space<vmem>>, vector<8x64xf32>,
    %c2_226 = arith.constant 2 : index
    %c0_227 = arith.constant 0 : index
    %c384_228 = arith.constant 384 : index
    %285 = vector.load %arg3[%c2_226, %c0_227, %c384_228] : memref<16x8x512xf32, #tpu.memory_space<vmem>>, vector<1x8x64xf32>
    %286 = vector.shape_cast %285 : vector<1x8x64xf32> to vector<8x64xf32>
    %cst_229 = arith.constant 5.000000e-01 : f32
    %287 = vector.broadcast %cst_229 : f32 to vector<8x64xf32>
    %288 = arith.mulf %287, %286 : vector<8x64xf32>
    %c3_230 = arith.constant 3 : index
    %c0_231 = arith.constant 0 : index
    %c384_232 = arith.constant 384 : index
    %289 = vector.load %arg3[%c3_230, %c0_231, %c384_232] : memref<16x8x512xf32, #tpu.memory_space<vmem>>, vector<1x8x64xf32>
    %290 = vector.shape_cast %289 : vector<1x8x64xf32> to vector<8x64xf32>
    %cst_233 = arith.constant 5.000000e-01 : f32
    %291 = vector.broadcast %cst_233 : f32 to vector<8x64xf32>
    %292 = arith.mulf %291, %290 : vector<8x64xf32>
    %293 = arith.addf %288, %292 : vector<8x64xf32>
    %c0_234 = arith.constant 0 : index
    %c308 = arith.constant 308 : index
    %294 = vector.load %arg2[%c0_234, %c308] : memref<8x768xf32, #tpu.memory_space<vmem>>, vector<8x64xf32>
    tpu.vector_store %arg2[%c0_234, %c308], %293 {strides = array<i32>} : memref<8x768xf32, #tpu.memory_space<vmem>>, vector<8x64xf32>,
    %c4_235 = arith.constant 4 : index
    %c0_236 = arith.constant 0 : index
    %c384_237 = arith.constant 384 : index
    %295 = vector.load %arg3[%c4_235, %c0_236, %c384_237] : memref<16x8x512xf32, #tpu.memory_space<vmem>>, vector<1x8x64xf32>
    %296 = vector.shape_cast %295 : vector<1x8x64xf32> to vector<8x64xf32>
    %cst_238 = arith.constant 5.000000e-01 : f32
    %297 = vector.broadcast %cst_238 : f32 to vector<8x64xf32>
    %298 = arith.mulf %297, %296 : vector<8x64xf32>
    %c5_239 = arith.constant 5 : index
    %c0_240 = arith.constant 0 : index
    %c384_241 = arith.constant 384 : index
    %299 = vector.load %arg3[%c5_239, %c0_240, %c384_241] : memref<16x8x512xf32, #tpu.memory_space<vmem>>, vector<1x8x64xf32>
    %300 = vector.shape_cast %299 : vector<1x8x64xf32> to vector<8x64xf32>
    %cst_242 = arith.constant 5.000000e-01 : f32
    %301 = vector.broadcast %cst_242 : f32 to vector<8x64xf32>
    %302 = arith.mulf %301, %300 : vector<8x64xf32>
    %303 = arith.addf %298, %302 : vector<8x64xf32>
    %c0_243 = arith.constant 0 : index
    %c372 = arith.constant 372 : index
    %304 = vector.load %arg2[%c0_243, %c372] : memref<8x768xf32, #tpu.memory_space<vmem>>, vector<8x64xf32>
    tpu.vector_store %arg2[%c0_243, %c372], %303 {strides = array<i32>} : memref<8x768xf32, #tpu.memory_space<vmem>>, vector<8x64xf32>,
    %c6_244 = arith.constant 6 : index
    %c0_245 = arith.constant 0 : index
    %c384_246 = arith.constant 384 : index
    %305 = vector.load %arg3[%c6_244, %c0_245, %c384_246] : memref<16x8x512xf32, #tpu.memory_space<vmem>>, vector<1x8x64xf32>
    %306 = vector.shape_cast %305 : vector<1x8x64xf32> to vector<8x64xf32>
    %cst_247 = arith.constant 5.000000e-01 : f32
    %307 = vector.broadcast %cst_247 : f32 to vector<8x64xf32>
    %308 = arith.mulf %307, %306 : vector<8x64xf32>
    %c7_248 = arith.constant 7 : index
    %c0_249 = arith.constant 0 : index
    %c384_250 = arith.constant 384 : index
    %309 = vector.load %arg3[%c7_248, %c0_249, %c384_250] : memref<16x8x512xf32, #tpu.memory_space<vmem>>, vector<1x8x64xf32>
    %310 = vector.shape_cast %309 : vector<1x8x64xf32> to vector<8x64xf32>
    %cst_251 = arith.constant 5.000000e-01 : f32
    %311 = vector.broadcast %cst_251 : f32 to vector<8x64xf32>
    %312 = arith.mulf %311, %310 : vector<8x64xf32>
    %313 = arith.addf %308, %312 : vector<8x64xf32>
    %c0_252 = arith.constant 0 : index
    %c436 = arith.constant 436 : index
    %314 = vector.load %arg2[%c0_252, %c436] : memref<8x768xf32, #tpu.memory_space<vmem>>, vector<8x64xf32>
    tpu.vector_store %arg2[%c0_252, %c436], %313 {strides = array<i32>} : memref<8x768xf32, #tpu.memory_space<vmem>>, vector<8x64xf32>,
    %c8_253 = arith.constant 8 : index
    %c0_254 = arith.constant 0 : index
    %c384_255 = arith.constant 384 : index
    %315 = vector.load %arg3[%c8_253, %c0_254, %c384_255] : memref<16x8x512xf32, #tpu.memory_space<vmem>>, vector<1x8x64xf32>
    %316 = vector.shape_cast %315 : vector<1x8x64xf32> to vector<8x64xf32>
    %cst_256 = arith.constant 5.000000e-01 : f32
    %317 = vector.broadcast %cst_256 : f32 to vector<8x64xf32>
    %318 = arith.mulf %317, %316 : vector<8x64xf32>
    %c9_257 = arith.constant 9 : index
    %c0_258 = arith.constant 0 : index
    %c384_259 = arith.constant 384 : index
    %319 = vector.load %arg3[%c9_257, %c0_258, %c384_259] : memref<16x8x512xf32, #tpu.memory_space<vmem>>, vector<1x8x64xf32>
    %320 = vector.shape_cast %319 : vector<1x8x64xf32> to vector<8x64xf32>
    %cst_260 = arith.constant 5.000000e-01 : f32
    %321 = vector.broadcast %cst_260 : f32 to vector<8x64xf32>
    %322 = arith.mulf %321, %320 : vector<8x64xf32>
    %323 = arith.addf %318, %322 : vector<8x64xf32>
    %c0_261 = arith.constant 0 : index
    %c500 = arith.constant 500 : index
    %324 = vector.load %arg2[%c0_261, %c500] : memref<8x768xf32, #tpu.memory_space<vmem>>, vector<8x64xf32>
    tpu.vector_store %arg2[%c0_261, %c500], %323 {strides = array<i32>} : memref<8x768xf32, #tpu.memory_space<vmem>>, vector<8x64xf32>,
    %c10_262 = arith.constant 10 : index
    %c0_263 = arith.constant 0 : index
    %c384_264 = arith.constant 384 : index
    %325 = vector.load %arg3[%c10_262, %c0_263, %c384_264] : memref<16x8x512xf32, #tpu.memory_space<vmem>>, vector<1x8x64xf32>
    %326 = vector.shape_cast %325 : vector<1x8x64xf32> to vector<8x64xf32>
    %cst_265 = arith.constant 5.000000e-01 : f32
    %327 = vector.broadcast %cst_265 : f32 to vector<8x64xf32>
    %328 = arith.mulf %327, %326 : vector<8x64xf32>
    %c11_266 = arith.constant 11 : index
    %c0_267 = arith.constant 0 : index
    %c384_268 = arith.constant 384 : index
    %329 = vector.load %arg3[%c11_266, %c0_267, %c384_268] : memref<16x8x512xf32, #tpu.memory_space<vmem>>, vector<1x8x64xf32>
    %330 = vector.shape_cast %329 : vector<1x8x64xf32> to vector<8x64xf32>
    %cst_269 = arith.constant 5.000000e-01 : f32
    %331 = vector.broadcast %cst_269 : f32 to vector<8x64xf32>
    %332 = arith.mulf %331, %330 : vector<8x64xf32>
    %333 = arith.addf %328, %332 : vector<8x64xf32>
    %c0_270 = arith.constant 0 : index
    %c564 = arith.constant 564 : index
    %334 = vector.load %arg2[%c0_270, %c564] : memref<8x768xf32, #tpu.memory_space<vmem>>, vector<8x64xf32>
    tpu.vector_store %arg2[%c0_270, %c564], %333 {strides = array<i32>} : memref<8x768xf32, #tpu.memory_space<vmem>>, vector<8x64xf32>,
    %c12_271 = arith.constant 12 : index
    %c0_272 = arith.constant 0 : index
    %c384_273 = arith.constant 384 : index
    %335 = vector.load %arg3[%c12_271, %c0_272, %c384_273] : memref<16x8x512xf32, #tpu.memory_space<vmem>>, vector<1x8x64xf32>
    %336 = vector.shape_cast %335 : vector<1x8x64xf32> to vector<8x64xf32>
    %cst_274 = arith.constant 5.000000e-01 : f32
    %337 = vector.broadcast %cst_274 : f32 to vector<8x64xf32>
    %338 = arith.mulf %337, %336 : vector<8x64xf32>
    %c13_275 = arith.constant 13 : index
    %c0_276 = arith.constant 0 : index
    %c384_277 = arith.constant 384 : index
    %339 = vector.load %arg3[%c13_275, %c0_276, %c384_277] : memref<16x8x512xf32, #tpu.memory_space<vmem>>, vector<1x8x64xf32>
    %340 = vector.shape_cast %339 : vector<1x8x64xf32> to vector<8x64xf32>
    %cst_278 = arith.constant 5.000000e-01 : f32
    %341 = vector.broadcast %cst_278 : f32 to vector<8x64xf32>
    %342 = arith.mulf %341, %340 : vector<8x64xf32>
    %343 = arith.addf %338, %342 : vector<8x64xf32>
    %c0_279 = arith.constant 0 : index
    %c628 = arith.constant 628 : index
    %344 = vector.load %arg2[%c0_279, %c628] : memref<8x768xf32, #tpu.memory_space<vmem>>, vector<8x64xf32>
    tpu.vector_store %arg2[%c0_279, %c628], %343 {strides = array<i32>} : memref<8x768xf32, #tpu.memory_space<vmem>>, vector<8x64xf32>,
    %c14_280 = arith.constant 14 : index
    %c0_281 = arith.constant 0 : index
    %c384_282 = arith.constant 384 : index
    %345 = vector.load %arg3[%c14_280, %c0_281, %c384_282] : memref<16x8x512xf32, #tpu.memory_space<vmem>>, vector<1x8x64xf32>
    %346 = vector.shape_cast %345 : vector<1x8x64xf32> to vector<8x64xf32>
    %cst_283 = arith.constant 5.000000e-01 : f32
    %347 = vector.broadcast %cst_283 : f32 to vector<8x64xf32>
    %348 = arith.mulf %347, %346 : vector<8x64xf32>
    %c15_284 = arith.constant 15 : index
    %c0_285 = arith.constant 0 : index
    %c384_286 = arith.constant 384 : index
    %349 = vector.load %arg3[%c15_284, %c0_285, %c384_286] : memref<16x8x512xf32, #tpu.memory_space<vmem>>, vector<1x8x64xf32>
    %350 = vector.shape_cast %349 : vector<1x8x64xf32> to vector<8x64xf32>
    %cst_287 = arith.constant 5.000000e-01 : f32
    %351 = vector.broadcast %cst_287 : f32 to vector<8x64xf32>
    %352 = arith.mulf %351, %350 : vector<8x64xf32>
    %353 = arith.addf %348, %352 : vector<8x64xf32>
    %c0_288 = arith.constant 0 : index
    %c692 = arith.constant 692 : index
    %354 = vector.load %arg2[%c0_288, %c692] : memref<8x768xf32, #tpu.memory_space<vmem>>, vector<8x64xf32>
    tpu.vector_store %arg2[%c0_288, %c692], %353 {strides = array<i32>} : memref<8x768xf32, #tpu.memory_space<vmem>>, vector<8x64xf32>,
    return
  }
}

</mosaic_0001>

<bundles_post_ra>
// kernel: tpu_custom_call.1
= control target key start
LH: loop header
LB: loop body
LE: loop exit
PB: predicated region body
PF: predicated region fallthrough
CT: control target
= control target key end

     0   :  { %7 = vsyncpa [#allocation4], 0  ;;  %s1221_s0 = inlined_call_operand.hbm [shape: f32[128,256], index: 0, kind: input, shape index: {}]   ;;  %s1222_s1 = inlined_call_operand.hbm [shape: f32[256,512], index: 1, kind: input, shape index: {}]   ;;  %s1223_s2 = inlined_call_operand.hbm [shape: f32[8,768], index: 2, kind: output, shape index: {}]  }
   0x1   :  { %8 = vsyncpa [#allocation7], 0 }
   0x2   :  { %9 = vsyncpa [#allocation5], 0  ;;  %s1132_s9 = smov [#allocation3]   ;;  %s1060_s13 = scalar_lea.hbm %s1221_s0, 4096 }
   0x3   :  { %s15_s10 = sshll.u32 %s1132_s9, 4  ;;  %p1061_p0 = scmp.ne.s32.totalorder %s1221_s0, %s1060_s13  ;;  %s16_s10 = int_to_ptr.vmem [resolvable:$true] %s15_s10 }
   0x4   :  { %p1064_p1 = scmp.lt.u32.totalorder %s1060_s13, %s1221_s0 }
   0x6   :  { %p1066_p2 = pnand %p1064_p1, %p1061_p0 }
   0x8   :  { %1069 = shalt.err (!%p1066_p2)
}
   0x9   :  { %s1070_s18 = scalar_lea.vmem %s16_s10, 4096  ;;  %p1075_p4 = scmp.lt.s32.totalorder %s16_s10, %s16_s10 }
   0xa   :  { %p1071_p3 = scmp.ne.s32.totalorder %s16_s10, %s1070_s18  ;;  %p1076_p5 = scmp.lt.s32.totalorder %s1070_s18, %s1070_s18 }
   0xc   :  { %p1077_p6 = por %p1076_p5, %p1075_p4 }
   0xe   :  { %p1078_p7 = pnand %p1077_p6, %p1071_p3 }
  0x10   :  { %1081 = shalt.err (!%p1078_p7)
}
  0x11   :  { %s1133_s19 = smov 256   ;;  %s1134_s20 = smov 16  }
  0x12   :  { %21 = dma.hbm_to_vmem [thread:$0]  %s1221_s0, 4096, %s16_s10, [#allocation4], %s1133_s19, %s1133_s19, %s1134_s20  }
  0x13   :  { %s1135_s23 = smov [#allocation6]   ;;  %s1082_s27 = scalar_lea.hbm %s1222_s1, 16384 }
  0x14   :  { %s27_s24 = sshll.u32 %s1135_s23, 4  ;;  %p1083_p8 = scmp.ne.s32.totalorder %s1222_s1, %s1082_s27  ;;  %s28_s24 = int_to_ptr.vmem [resolvable:$true] %s27_s24 }
  0x15   :  { %p1086_p9 = scmp.lt.u32.totalorder %s1082_s27, %s1222_s1 }
  0x17   :  { %p1088_p10 = pnand %p1086_p9, %p1083_p8 }
  0x19   :  { %1091 = shalt.err (!%p1088_p10)
}
  0x1a   :  { %s1092_s4 = scalar_lea.vmem %s28_s24, 16384  ;;  %p1097_p12 = scmp.lt.s32.totalorder %s28_s24, %s28_s24 }
  0x1b   :  { %p1093_p11 = scmp.ne.s32.totalorder %s28_s24, %s1092_s4  ;;  %p1098_p13 = scmp.lt.s32.totalorder %s1092_s4, %s1092_s4 }
  0x1d   :  { %p1099_p0 = por %p1098_p13, %p1097_p12 }
  0x1f   :  { %p1100_p1 = pnand %p1099_p0, %p1093_p11 }
  0x21   :  { %1103 = shalt.err (!%p1100_p1)
}
  0x22   :  { %s1136_s0 = smov 512   ;;  %s1137_s5 = smov 32  }
  0x23   :  { %33 = dma.hbm_to_vmem [thread:$0]  %s1222_s1, 16384, %s28_s24, [#allocation7], %s1136_s0, %s1136_s0, %s1137_s5  }
  0x24   :  { %1126 = dma.done.wait [#allocation4], 4096  }
  0x25   :  { %1127 = vsyncadd [#allocation4], 4294963200 }
  0x26   :  { %1128 = dma.done.wait [#allocation7], 16384  }
  0x27   :  { %1129 = vsyncadd [#allocation7], 4294950912  ;;  %v73_v0 = vld [vmem:[#allocation6 + $0x8] sm:$0xff]  ;;  %v75_v2 = vld [vmem:[#allocation6 + $0x18] sm:$0xff]  ;;  %s1138_s1 = smov 116   ;;  %s1139_s8 = smov 28  }
  0x28   :  { %v77_v1 = vld [vmem:[#allocation6 + $0x28] sm:$0xff]  ;;  %v79_v4 = vld [vmem:[#allocation6 + $0x38] sm:$0xff]  ;;  %v72_v5 = vld [vmem:[#allocation6] sm:$0xff]  ;;  %s1140_s9 = smov 52   ;;  %s1141_s10 = smov 64   ;;  %vm648_vm0 = vcmask 7168  }
  0x29   :  { %v914_v3 = vpack.c.bf16 %v77_v1, %v73_v0  ;;  %v76_v6 = vld [vmem:[#allocation6 + $0x20] sm:$0xff]  ;;  %v978_v7 = vpack.c.bf16 %v79_v4, %v75_v2  ;;  %v74_v9 = vld [vmem:[#allocation6 + $0x10] sm:$0xff]  ;;  %v81_v11 = vld [vmem:[#allocation6 + $0x48] sm:$0xff]  ;;  %s1142_s11 = smov 1   ;;  %s1143_s12 = smov 100   ;;  %vm822_vm1 = vcmask 424960  }
  0x2a   :  { %v916_v8 = vpack.c.bf16 %v76_v6, %v72_v5  ;;  %v78_v10 = vld [vmem:[#allocation6 + $0x30] sm:$0xff]  ;;  %v85_v13 = vld [vmem:[#allocation6 + $0x68] sm:$0xff]  ;;  %v83_v14 = vld [vmem:[#allocation6 + $0x58] sm:$0xff]  ;;  %s1144_s13 = smov 8   ;;  %s1145_s14 = smov 10   ;;  %vm833_vm2 = vcmask 949664  }
  0x2b   :  { %915 = vmatprep.subr.bf16.mxu0 %v914_v3  ;;  %v980_v12 = vpack.c.bf16 %v78_v10, %v74_v9  ;;  %v87_v15 = vld [vmem:[#allocation6 + $0x78] sm:$0xff]  ;;  %979 = vmatprep.subr.bf16.mxu1 %v978_v7  ;;  %v918_v16 = vpack.c.bf16 %v85_v13, %v81_v11  ;;  %v80_v18 = vld [vmem:[#allocation6 + $0x40] sm:$0xff]  ;;  %v82_v20 = vld [vmem:[#allocation6 + $0x50] sm:$0xff]  ;;  %s1146_s15 = smov 44   ;;  %s1147_s16 = smov 80   ;;  %vm671_vm3 = vcmask 80904  }
  0x2c   :  { %917 = vmatpush1.bf16.msra.mxu0 %v916_v8  ;;  %v982_v17 = vpack.c.bf16 %v87_v15, %v83_v14  ;;  %v84_v19 = vld [vmem:[#allocation6 + $0x60] sm:$0xff]  ;;  %v86_v22 = vld [vmem:[#allocation6 + $0x70] sm:$0xff]  ;;  %v89_v23 = vld [vmem:[#allocation6 + $0x88] sm:$0xff]  ;;  %s1148_s17 = smov 19   ;;  %vm764_vm4 = vcmask 64512   ;;  %vm820_vm5 = vcmask 1048480  }
  0x2d   :  { %981 = vmatpush1.bf16.msra.mxu1 %v980_v12  ;;  %v920_v21 = vpack.c.bf16 %v84_v19, %v80_v18  ;;  %v93_v24 = vld [vmem:[#allocation6 + $0xa8] sm:$0xff]  ;;  %919 = vmatprep.subr.bf16.mxu0 %v918_v16  ;;  %v984_v25 = vpack.c.bf16 %v86_v22, %v82_v20  ;;  %v91_v27 = vld [vmem:[#allocation6 + $0x98] sm:$0xff]  ;;  %v88_v29 = vld [vmem:[#allocation6 + $0x80] sm:$0xff]  ;;  %vm778_vm6 = vcmask 359488   ;;  %vm694_vm7 = vcmask 154704   ;;  %s1149_s18 = smov [#allocation8]  }
  0x2e   :  { %983 = vmatprep.subr.bf16.mxu1 %v982_v17  ;;  %v922_v26 = vpack.c.bf16 %v93_v24, %v89_v23  ;;  %v95_v28 = vld [vmem:[#allocation6 + $0xb8] sm:$0xff]  ;;  %v92_v31 = vld [vmem:[#allocation6 + $0xa0] sm:$0xff]  ;;  %v90_v32 = vld [vmem:[#allocation6 + $0x90] sm:$0xff]  ;;  %vm795_vm8 = vcmask 654688   ;;  %vm809_vm9 = vcmask 949888   ;;  %vm717_vm10 = vcmask 228504  }
  0x2f   :  { %v986_v30 = vpack.c.bf16 %v95_v28, %v91_v27  ;;  %v94_v33 = vld [vmem:[#allocation6 + $0xb0] sm:$0xff]  ;;  %v924_v34 = vpack.c.bf16 %v92_v31, %v88_v29  ;;  %v97_v35 = vld [vmem:[#allocation6 + $0xc8] sm:$0xff]  ;;  %v99_v37 = vld [vmem:[#allocation6 + $0xd8] sm:$0xff]  ;;  %vm731_vm11 = vcmask 523488   ;;  %vm748_vm12 = vcmask 818688   ;;  %s904_s19 = sshll.u32 %s1149_s18, 4  ;;  %s905_s19 = int_to_ptr.vmem [resolvable:$true] %s904_s19 }
  0x30   :  { %921 = vmatpush1.bf16.msra.mxu0 %v920_v21  ;;  %v101_v36 = vld [vmem:[#allocation6 + $0xe8] sm:$0xff]  ;;  %v988_v38 = vpack.c.bf16 %v94_v33, %v90_v32  ;;  %v103_v40 = vld [vmem:[#allocation6 + $0xf8] sm:$0xff]  ;;  %v96_v41 = vld [vmem:[#allocation6 + $0xc0] sm:$0xff]  ;;  %vm762_vm13 = vcmask 1048352   ;;  %s1104_s20 = scalar_lea.vmem %s905_s19, 768  ;;  %p1109_p3 = scmp.lt.s32.totalorder %s905_s19, %s905_s19 }
  0x31   :  { %985 = vmatpush1.bf16.msra.mxu1 %v984_v25  ;;  %923 = vmatprep.subr.bf16.mxu0 %v922_v26  ;;  %v926_v39 = vpack.c.bf16 %v101_v36, %v97_v35  ;;  %v100_v42 = vld [vmem:[#allocation6 + $0xe0] sm:$0xff]  ;;  %v990_v43 = vpack.c.bf16 %v103_v40, %v99_v37  ;;  %v98_v44 = vld [vmem:[#allocation6 + $0xd0] sm:$0xff]  ;;  %v105_v46 = vld [vmem:[#allocation6 + $0x108] sm:$0xff]  ;;  %p1105_p2 = scmp.ne.s32.totalorder %s905_s19, %s1104_s20  ;;  %p1110_p4 = scmp.lt.s32.totalorder %s1104_s20, %s1104_s20 }
  0x32   :  { %987 = vmatprep.subr.bf16.mxu1 %v986_v30  ;;  %v102_v45 = vld [vmem:[#allocation6 + $0xf0] sm:$0xff]  ;;  %v109_v47 = vld [vmem:[#allocation6 + $0x128] sm:$0xff]  ;;  %v107_v48 = vld [vmem:[#allocation6 + $0x118] sm:$0xff]  ;;  %v928_v50 = vpack.c.bf16 %v100_v42, %v96_v41 }
  0x33   :  { %v111_v49 = vld [vmem:[#allocation6 + $0x138] sm:$0xff]  ;;  %v992_v51 = vpack.c.bf16 %v102_v45, %v98_v44  ;;  %v930_v52 = vpack.c.bf16 %v109_v47, %v105_v46  ;;  %v104_v53 = vld [vmem:[#allocation6 + $0x100] sm:$0xff]  ;;  %v106_v55 = vld [vmem:[#allocation6 + $0x110] sm:$0xff]  ;;  %p1111_p5 = por %p1110_p4, %p1109_p3 }
  0x34   :  { %925 = vmatpush1.bf16.msra.mxu0 %v924_v34  ;;  %v108_v54 = vld [vmem:[#allocation6 + $0x120] sm:$0xff]  ;;  %v994_v56 = vpack.c.bf16 %v111_v49, %v107_v48  ;;  %v110_v57 = vld [vmem:[#allocation6 + $0x130] sm:$0xff]  ;;  %v113_v58 = vld [vmem:[#allocation6 + $0x148] sm:$0xff] }
  0x35   :  { %989 = vmatpush1.bf16.msra.mxu1 %v988_v38  ;;  %927 = vmatprep.subr.bf16.mxu0 %v926_v39  ;;  %v117_v59 = vld [vmem:[#allocation6 + $0x168] sm:$0xff]  ;;  %v115_v60 = vld [vmem:[#allocation6 + $0x158] sm:$0xff]  ;;  %v932_v62 = vpack.c.bf16 %v108_v54, %v104_v53  ;;  %v996_v63 = vpack.c.bf16 %v110_v57, %v106_v55  ;;  %v112_v1 = vld [vmem:[#allocation6 + $0x140] sm:$0xff]  ;;  %p1112_p6 = pnand %p1111_p5, %p1105_p2 }
  0x36   :  { %991 = vmatprep.subr.bf16.mxu1 %v990_v43  ;;  %v119_v61 = vld [vmem:[#allocation6 + $0x178] sm:$0xff]  ;;  %v934_v0 = vpack.c.bf16 %v117_v59, %v113_v58  ;;  %v116_v2 = vld [vmem:[#allocation6 + $0x160] sm:$0xff]  ;;  %v114_v3 = vld [vmem:[#allocation6 + $0x150] sm:$0xff] }
  0x37   :  { %v998_v4 = vpack.c.bf16 %v119_v61, %v115_v60  ;;  %v118_v5 = vld [vmem:[#allocation6 + $0x170] sm:$0xff]  ;;  %v121_v6 = vld [vmem:[#allocation6 + $0x188] sm:$0xff]  ;;  %v123_v8 = vld [vmem:[#allocation6 + $0x198] sm:$0xff]  ;;  %v936_v10 = vpack.c.bf16 %v116_v2, %v112_v1 }
  0x38   :  { %929 = vmatpush1.bf16.msra.mxu0 %v928_v50  ;;  %v125_v7 = vld [vmem:[#allocation6 + $0x1a8] sm:$0xff]  ;;  %v127_v9 = vld [vmem:[#allocation6 + $0x1b8] sm:$0xff]  ;;  %v1000_v11 = vpack.c.bf16 %v118_v5, %v114_v3  ;;  %v120_v13 = vld [vmem:[#allocation6 + $0x180] sm:$0xff] }
  0x39   :  { %993 = vmatpush1.bf16.msra.mxu1 %v992_v51  ;;  %931 = vmatprep.subr.bf16.mxu0 %v930_v52  ;;  %v938_v12 = vpack.c.bf16 %v125_v7, %v121_v6  ;;  %v124_v14 = vld [vmem:[#allocation6 + $0x1a0] sm:$0xff]  ;;  %v122_v15 = vld [vmem:[#allocation6 + $0x190] sm:$0xff]  ;;  %v1002_v16 = vpack.c.bf16 %v127_v9, %v123_v8  ;;  %v129_v18 = vld [vmem:[#allocation6 + $0x1c8] sm:$0xff] }
  0x3a   :  { %995 = vmatprep.subr.bf16.mxu1 %v994_v56  ;;  %v126_v17 = vld [vmem:[#allocation6 + $0x1b0] sm:$0xff]  ;;  %v133_v19 = vld [vmem:[#allocation6 + $0x1e8] sm:$0xff]  ;;  %v131_v20 = vld [vmem:[#allocation6 + $0x1d8] sm:$0xff]  ;;  %v940_v22 = vpack.c.bf16 %v124_v14, %v120_v13 }
  0x3b   :  { %v135_v21 = vld [vmem:[#allocation6 + $0x1f8] sm:$0xff]  ;;  %v1004_v23 = vpack.c.bf16 %v126_v17, %v122_v15  ;;  %v942_v24 = vpack.c.bf16 %v133_v19, %v129_v18  ;;  %v128_v25 = vld [vmem:[#allocation6 + $0x1c0] sm:$0xff]  ;;  %v130_v27 = vld [vmem:[#allocation6 + $0x1d0] sm:$0xff] }
  0x3c   :  { %933 = vmatpush1.bf16.msra.mxu0 %v932_v62  ;;  %v132_v26 = vld [vmem:[#allocation6 + $0x1e0] sm:$0xff]  ;;  %v1006_v28 = vpack.c.bf16 %v135_v21, %v131_v20  ;;  %v134_v29 = vld [vmem:[#allocation6 + $0x1f0] sm:$0xff]  ;;  %v137_v30 = vld [vmem:[#allocation6 + $0x208] sm:$0xff] }
  0x3d   :  { %997 = vmatpush1.bf16.msra.mxu1 %v996_v63  ;;  %935 = vmatprep.subr.bf16.mxu0 %v934_v0  ;;  %v141_v31 = vld [vmem:[#allocation6 + $0x228] sm:$0xff]  ;;  %v139_v32 = vld [vmem:[#allocation6 + $0x218] sm:$0xff]  ;;  %v944_v34 = vpack.c.bf16 %v132_v26, %v128_v25  ;;  %v1008_v35 = vpack.c.bf16 %v134_v29, %v130_v27  ;;  %v136_v37 = vld [vmem:[#allocation6 + $0x200] sm:$0xff] }
  0x3e   :  { %999 = vmatprep.subr.bf16.mxu1 %v998_v4  ;;  %v143_v33 = vld [vmem:[#allocation6 + $0x238] sm:$0xff]  ;;  %v946_v36 = vpack.c.bf16 %v141_v31, %v137_v30  ;;  %v140_v38 = vld [vmem:[#allocation6 + $0x220] sm:$0xff]  ;;  %v138_v39 = vld [vmem:[#allocation6 + $0x210] sm:$0xff] }
  0x3f   :  { %v1010_v40 = vpack.c.bf16 %v143_v33, %v139_v32  ;;  %v142_v41 = vld [vmem:[#allocation6 + $0x230] sm:$0xff]  ;;  %v145_v42 = vld [vmem:[#allocation6 + $0x248] sm:$0xff]  ;;  %v147_v44 = vld [vmem:[#allocation6 + $0x258] sm:$0xff]  ;;  %v948_v46 = vpack.c.bf16 %v140_v38, %v136_v37 }
  0x40   :  { %937 = vmatpush1.bf16.msra.mxu0 %v936_v10  ;;  %v149_v43 = vld [vmem:[#allocation6 + $0x268] sm:$0xff]  ;;  %v151_v45 = vld [vmem:[#allocation6 + $0x278] sm:$0xff]  ;;  %v1012_v47 = vpack.c.bf16 %v142_v41, %v138_v39  ;;  %v144_v49 = vld [vmem:[#allocation6 + $0x240] sm:$0xff] }
  0x41   :  { %1001 = vmatpush1.bf16.msra.mxu1 %v1000_v11  ;;  %939 = vmatprep.subr.bf16.mxu0 %v938_v12  ;;  %v950_v48 = vpack.c.bf16 %v149_v43, %v145_v42  ;;  %v148_v50 = vld [vmem:[#allocation6 + $0x260] sm:$0xff]  ;;  %v146_v51 = vld [vmem:[#allocation6 + $0x250] sm:$0xff]  ;;  %v1014_v52 = vpack.c.bf16 %v151_v45, %v147_v44  ;;  %v153_v54 = vld [vmem:[#allocation6 + $0x288] sm:$0xff] }
  0x42   :  { %1003 = vmatprep.subr.bf16.mxu1 %v1002_v16  ;;  %v150_v53 = vld [vmem:[#allocation6 + $0x270] sm:$0xff]  ;;  %v157_v55 = vld [vmem:[#allocation6 + $0x2a8] sm:$0xff]  ;;  %v155_v56 = vld [vmem:[#allocation6 + $0x298] sm:$0xff]  ;;  %v952_v58 = vpack.c.bf16 %v148_v50, %v144_v49 }
  0x43   :  { %v159_v57 = vld [vmem:[#allocation6 + $0x2b8] sm:$0xff]  ;;  %v1016_v59 = vpack.c.bf16 %v150_v53, %v146_v51  ;;  %v954_v60 = vpack.c.bf16 %v157_v55, %v153_v54  ;;  %v152_v61 = vld [vmem:[#allocation6 + $0x280] sm:$0xff]  ;;  %v154_v63 = vld [vmem:[#allocation6 + $0x290] sm:$0xff] }
  0x44   :  { %941 = vmatpush1.bf16.msra.mxu0 %v940_v22  ;;  %v156_v62 = vld [vmem:[#allocation6 + $0x2a0] sm:$0xff]  ;;  %v1018_v0 = vpack.c.bf16 %v159_v57, %v155_v56  ;;  %v158_v1 = vld [vmem:[#allocation6 + $0x2b0] sm:$0xff]  ;;  %v161_v2 = vld [vmem:[#allocation6 + $0x2c8] sm:$0xff] }
  0x45   :  { %1005 = vmatpush1.bf16.msra.mxu1 %v1004_v23  ;;  %943 = vmatprep.subr.bf16.mxu0 %v942_v24  ;;  %v165_v3 = vld [vmem:[#allocation6 + $0x2e8] sm:$0xff]  ;;  %v163_v4 = vld [vmem:[#allocation6 + $0x2d8] sm:$0xff]  ;;  %v956_v6 = vpack.c.bf16 %v156_v62, %v152_v61  ;;  %v160_v7 = vld [vmem:[#allocation6 + $0x2c0] sm:$0xff]  ;;  %v1020_v8 = vpack.c.bf16 %v158_v1, %v154_v63 }
  0x46   :  { %1007 = vmatprep.subr.bf16.mxu1 %v1006_v28  ;;  %v167_v5 = vld [vmem:[#allocation6 + $0x2f8] sm:$0xff]  ;;  %v958_v9 = vpack.c.bf16 %v165_v3, %v161_v2  ;;  %v164_v10 = vld [vmem:[#allocation6 + $0x2e0] sm:$0xff]  ;;  %v162_v11 = vld [vmem:[#allocation6 + $0x2d0] sm:$0xff] }
  0x47   :  { %v166_v12 = vld [vmem:[#allocation6 + $0x2f0] sm:$0xff]  ;;  %v1022_v13 = vpack.c.bf16 %v167_v5, %v163_v4  ;;  %v169_v14 = vld [vmem:[#allocation6 + $0x308] sm:$0xff]  ;;  %v171_v17 = vld [vmem:[#allocation6 + $0x318] sm:$0xff]  ;;  %v960_v19 = vpack.c.bf16 %v164_v10, %v160_v7 }
  0x48   :  { %945 = vmatpush1.bf16.msra.mxu0 %v944_v34  ;;  %v173_v15 = vld [vmem:[#allocation6 + $0x328] sm:$0xff]  ;;  %v175_v18 = vld [vmem:[#allocation6 + $0x338] sm:$0xff]  ;;  %v1024_v20 = vpack.c.bf16 %v166_v12, %v162_v11  ;;  %v168_v22 = vld [vmem:[#allocation6 + $0x300] sm:$0xff] }
  0x49   :  { %1009 = vmatpush1.bf16.msra.mxu1 %v1008_v35  ;;  %947 = vmatprep.subr.bf16.mxu0 %v946_v36  ;;  %v41_v16 = vld [vmem:[#allocation3 + $0x8] sm:$0xff]  ;;  %v962_v21 = vpack.c.bf16 %v173_v15, %v169_v14  ;;  %v172_v23 = vld [vmem:[#allocation6 + $0x320] sm:$0xff]  ;;  %v170_v24 = vld [vmem:[#allocation6 + $0x310] sm:$0xff]  ;;  %v1026_v25 = vpack.c.bf16 %v175_v18, %v171_v17 }
  0x4a   :  { %1011 = vmatprep.subr.bf16.mxu1 %v1010_v40  ;;  %264 = vmatprep.mubr.f32.mxu0 %v41_v16  ;;  %v174_v26 = vld [vmem:[#allocation6 + $0x330] sm:$0xff]  ;;  %v177_v27 = vld [vmem:[#allocation6 + $0x348] sm:$0xff]  ;;  %v179_v29 = vld [vmem:[#allocation6 + $0x358] sm:$0xff]  ;;  %v964_v31 = vpack.c.bf16 %v172_v23, %v168_v22 }
  0x4b   :  { %425 = vmatprep.mubr.f32.mxu1 %v41_v16  ;;  %v181_v28 = vld [vmem:[#allocation6 + $0x368] sm:$0xff]  ;;  %v183_v30 = vld [vmem:[#allocation6 + $0x378] sm:$0xff]  ;;  %v1028_v32 = vpack.c.bf16 %v174_v26, %v170_v24  ;;  %v176_v34 = vld [vmem:[#allocation6 + $0x340] sm:$0xff] }
  0x4c   :  { %949 = vmatpush1.bf16.msra.mxu0 %v948_v46  ;;  %v966_v33 = vpack.c.bf16 %v181_v28, %v177_v27  ;;  %v180_v35 = vld [vmem:[#allocation6 + $0x360] sm:$0xff]  ;;  %v178_v36 = vld [vmem:[#allocation6 + $0x350] sm:$0xff]  ;;  %v1030_v37 = vpack.c.bf16 %v183_v30, %v179_v29  ;;  %v185_v39 = vld [vmem:[#allocation6 + $0x388] sm:$0xff] }
  0x4d   :  { %1013 = vmatpush1.bf16.msra.mxu1 %v1012_v47  ;;  %951 = vmatprep.subr.bf16.mxu0 %v950_v48  ;;  %v182_v38 = vld [vmem:[#allocation6 + $0x370] sm:$0xff]  ;;  %v189_v40 = vld [vmem:[#allocation6 + $0x3a8] sm:$0xff]  ;;  %v187_v41 = vld [vmem:[#allocation6 + $0x398] sm:$0xff]  ;;  %v968_v43 = vpack.c.bf16 %v180_v35, %v176_v34 }
  0x4e   :  { %1015 = vmatprep.subr.bf16.mxu1 %v1014_v52  ;;  %v191_v42 = vld [vmem:[#allocation6 + $0x3b8] sm:$0xff]  ;;  %v1032_v44 = vpack.c.bf16 %v182_v38, %v178_v36  ;;  %v970_v45 = vpack.c.bf16 %v189_v40, %v185_v39  ;;  %v184_v46 = vld [vmem:[#allocation6 + $0x380] sm:$0xff]  ;;  %v186_v48 = vld [vmem:[#allocation6 + $0x390] sm:$0xff] }
  0x4f   :  { %v188_v47 = vld [vmem:[#allocation6 + $0x3a0] sm:$0xff]  ;;  %v1034_v49 = vpack.c.bf16 %v191_v42, %v187_v41  ;;  %v190_v50 = vld [vmem:[#allocation6 + $0x3b0] sm:$0xff]  ;;  %v193_v51 = vld [vmem:[#allocation6 + $0x3c8] sm:$0xff] }
  0x50   :  { %953 = vmatpush1.bf16.msra.mxu0 %v952_v58  ;;  %v197_v52 = vld [vmem:[#allocation6 + $0x3e8] sm:$0xff]  ;;  %v195_v53 = vld [vmem:[#allocation6 + $0x3d8] sm:$0xff]  ;;  %v972_v55 = vpack.c.bf16 %v188_v47, %v184_v46  ;;  %v1036_v56 = vpack.c.bf16 %v190_v50, %v186_v48  ;;  %v192_v58 = vld [vmem:[#allocation6 + $0x3c0] sm:$0xff] }
  0x51   :  { %1017 = vmatpush1.bf16.msra.mxu1 %v1016_v59  ;;  %955 = vmatprep.subr.bf16.mxu0 %v954_v60  ;;  %v199_v54 = vld [vmem:[#allocation6 + $0x3f8] sm:$0xff]  ;;  %v974_v57 = vpack.c.bf16 %v197_v52, %v193_v51  ;;  %v196_v59 = vld [vmem:[#allocation6 + $0x3e0] sm:$0xff]  ;;  %v194_v61 = vld [vmem:[#allocation6 + $0x3d0] sm:$0xff] }
  0x52   :  { %1019 = vmatprep.subr.bf16.mxu1 %v1018_v0  ;;  %v1038_v60 = vpack.c.bf16 %v199_v54, %v195_v53  ;;  %v198_v62 = vld [vmem:[#allocation6 + $0x3f0] sm:$0xff]  ;;  %v976_v63 = vpack.c.bf16 %v196_v59, %v192_v58  ;;  %v40_v1 = vld [vmem:[#allocation3] sm:$0xff]  ;;  %v43_v2 = vld [vmem:[#allocation3 + $0x18] sm:$0xff] }
  0x53   :  { %v1040_v0 = vpack.c.bf16 %v198_v62, %v194_v61  ;;  %v42_v3 = vld [vmem:[#allocation3 + $0x10] sm:$0xff]  ;;  %v45_v4 = vld [vmem:[#allocation3 + $0x28] sm:$0xff]  ;;  %v44_v5 = vld [vmem:[#allocation3 + $0x20] sm:$0xff] }
  0x54   :  { %957 = vmatpush1.bf16.msra.mxu0 %v956_v6  ;;  %v47_v6 = vld [vmem:[#allocation3 + $0x38] sm:$0xff]  ;;  %v46_v7 = vld [vmem:[#allocation3 + $0x30] sm:$0xff]  ;;  %v53_v12 = vld [vmem:[#allocation3 + $0x68] sm:$0xff] }
  0x55   :  { %1021 = vmatpush1.bf16.msra.mxu1 %v1020_v8  ;;  %959 = vmatprep.subr.bf16.mxu0 %v958_v9  ;;  %v49_v8 = vld [vmem:[#allocation3 + $0x48] sm:$0xff]  ;;  %v48_v9 = vld [vmem:[#allocation3 + $0x40] sm:$0xff]  ;;  %v51_v10 = vld [vmem:[#allocation3 + $0x58] sm:$0xff] }
  0x56   :  { %1023 = vmatprep.subr.bf16.mxu1 %v1022_v13  ;;  %v50_v11 = vld [vmem:[#allocation3 + $0x50] sm:$0xff]  ;;  %v52_v13 = vld [vmem:[#allocation3 + $0x60] sm:$0xff]  ;;  %v55_v14 = vld [vmem:[#allocation3 + $0x78] sm:$0xff] }
  0x57   :  { %v54_v15 = vld [vmem:[#allocation3 + $0x70] sm:$0xff]  ;;  %v57_v16 = vld [vmem:[#allocation3 + $0x88] sm:$0xff]  ;;  %v56_v17 = vld [vmem:[#allocation3 + $0x80] sm:$0xff] }
  0x58   :  { %961 = vmatpush1.bf16.msra.mxu0 %v960_v19  ;;  %v59_v18 = vld [vmem:[#allocation3 + $0x98] sm:$0xff]  ;;  %v58_v19 = vld [vmem:[#allocation3 + $0x90] sm:$0xff]  ;;  %v65_v24 = vld [vmem:[#allocation3 + $0xc8] sm:$0xff] }
  0x59   :  { %1025 = vmatpush1.bf16.msra.mxu1 %v1024_v20  ;;  %963 = vmatprep.subr.bf16.mxu0 %v962_v21  ;;  %v61_v20 = vld [vmem:[#allocation3 + $0xa8] sm:$0xff]  ;;  %v60_v21 = vld [vmem:[#allocation3 + $0xa0] sm:$0xff]  ;;  %v63_v22 = vld [vmem:[#allocation3 + $0xb8] sm:$0xff] }
  0x5a   :  { %1027 = vmatprep.subr.bf16.mxu1 %v1026_v25  ;;  %v62_v23 = vld [vmem:[#allocation3 + $0xb0] sm:$0xff]  ;;  %v64_v25 = vld [vmem:[#allocation3 + $0xc0] sm:$0xff]  ;;  %v67_v26 = vld [vmem:[#allocation3 + $0xd8] sm:$0xff] }
  0x5b   :  { %v66_v27 = vld [vmem:[#allocation3 + $0xd0] sm:$0xff]  ;;  %v69_v28 = vld [vmem:[#allocation3 + $0xe8] sm:$0xff]  ;;  %v68_v29 = vld [vmem:[#allocation3 + $0xe0] sm:$0xff] }
  0x5c   :  { %965 = vmatpush1.bf16.msra.mxu0 %v964_v31  ;;  %v71_v30 = vld [vmem:[#allocation3 + $0xf8] sm:$0xff]  ;;  %v70_v31 = vld [vmem:[#allocation3 + $0xf0] sm:$0xff] }
  0x5d   :  { %1029 = vmatpush1.bf16.msra.mxu1 %v1028_v32  ;;  %967 = vmatprep.subr.bf16.mxu0 %v966_v33 }
  0x5e   :  { %1031 = vmatprep.subr.bf16.mxu1 %v1030_v37 }
  0x60   :  { %969 = vmatpush1.bf16.msra.mxu0 %v968_v43 }
  0x61   :  { %1033 = vmatpush1.bf16.msra.mxu1 %v1032_v44  ;;  %971 = vmatprep.subr.bf16.mxu0 %v970_v45 }
  0x62   :  { %1035 = vmatprep.subr.bf16.mxu1 %v1034_v49 }
  0x64   :  { %973 = vmatpush1.bf16.msra.mxu0 %v972_v55 }
  0x65   :  { %1037 = vmatpush1.bf16.msra.mxu1 %v1036_v56  ;;  %975 = vmatprep.subr.bf16.mxu0 %v974_v57 }
  0x66   :  { %1039 = vmatprep.subr.bf16.mxu1 %v1038_v60 }
  0x68   :  { %977 = vmatpush1.bf16.msra.mxu0 %v976_v63 }
  0x69   :  { %1041 = vmatpush1.bf16.msra.mxu1 %v1040_v0 }
  0x6b   :  { %265 = vmatmul.mubr.f32.vlgmr.msra.gmra.mrb[0].mxu0 %v40_v1 }
  0x6c   :  { %426 = vmatmul.mubr.f32.vlgmr.msra.gmra.mrb[0].mxu1 %v40_v1  ;;  %270 = vmatprep.mubr.f32.mxu0 %v43_v2 }
  0x6d   :  { %431 = vmatprep.mubr.f32.mxu1 %v43_v2 }
  0x6f   :  { %271 = vmatmul.mubr.f32.gmra.mrb[2].mxu0 %v42_v3 }
  0x70   :  { %432 = vmatmul.mubr.f32.gmra.mrb[2].mxu1 %v42_v3  ;;  %276 = vmatprep.mubr.f32.mxu0 %v45_v4 }
  0x71   :  { %437 = vmatprep.mubr.f32.mxu1 %v45_v4 }
  0x73   :  { %277 = vmatmul.mubr.f32.gmra.mrb[4].mxu0 %v44_v5 }
  0x74   :  { %438 = vmatmul.mubr.f32.gmra.mrb[4].mxu1 %v44_v5  ;;  %282 = vmatprep.mubr.f32.mxu0 %v47_v6 }
  0x75   :  { %443 = vmatprep.mubr.f32.mxu1 %v47_v6 }
  0x77   :  { %283 = vmatmul.mubr.f32.gmra.mrb[6].mxu0 %v46_v7 }
  0x78   :  { %444 = vmatmul.mubr.f32.gmra.mrb[6].mxu1 %v46_v7  ;;  %288 = vmatprep.mubr.f32.mxu0 %v49_v8 }
  0x79   :  { %449 = vmatprep.mubr.f32.mxu1 %v49_v8 }
  0x7b   :  { %289 = vmatmul.mubr.f32.gmra.mrb[8].mxu0 %v48_v9 }
  0x7c   :  { %450 = vmatmul.mubr.f32.gmra.mrb[8].mxu1 %v48_v9  ;;  %294 = vmatprep.mubr.f32.mxu0 %v51_v10 }
  0x7d   :  { %455 = vmatprep.mubr.f32.mxu1 %v51_v10 }
  0x7f   :  { %295 = vmatmul.mubr.f32.gmra.mrb[10].mxu0 %v50_v11 }
  0x80   :  { %456 = vmatmul.mubr.f32.gmra.mrb[10].mxu1 %v50_v11  ;;  %300 = vmatprep.mubr.f32.mxu0 %v53_v12 }
  0x81   :  { %461 = vmatprep.mubr.f32.mxu1 %v53_v12 }
  0x83   :  { %301 = vmatmul.mubr.f32.gmra.mrb[12].mxu0 %v52_v13 }
  0x84   :  { %462 = vmatmul.mubr.f32.gmra.mrb[12].mxu1 %v52_v13  ;;  %306 = vmatprep.mubr.f32.mxu0 %v55_v14 }
  0x85   :  { %467 = vmatprep.mubr.f32.mxu1 %v55_v14 }
  0x87   :  { %307 = vmatmul.mubr.f32.gmra.mrb[14].mxu0 %v54_v15 }
  0x88   :  { %468 = vmatmul.mubr.f32.gmra.mrb[14].mxu1 %v54_v15  ;;  %312 = vmatprep.mubr.f32.mxu0 %v57_v16 }
  0x89   :  { %473 = vmatprep.mubr.f32.mxu1 %v57_v16 }
  0x8b   :  { %313 = vmatmul.mubr.f32.gmra.mrb[16].mxu0 %v56_v17 }
  0x8c   :  { %474 = vmatmul.mubr.f32.gmra.mrb[16].mxu1 %v56_v17  ;;  %318 = vmatprep.mubr.f32.mxu0 %v59_v18 }
  0x8d   :  { %479 = vmatprep.mubr.f32.mxu1 %v59_v18 }
  0x8f   :  { %319 = vmatmul.mubr.f32.gmra.mrb[18].mxu0 %v58_v19 }
  0x90   :  { %480 = vmatmul.mubr.f32.gmra.mrb[18].mxu1 %v58_v19  ;;  %324 = vmatprep.mubr.f32.mxu0 %v61_v20 }
  0x91   :  { %485 = vmatprep.mubr.f32.mxu1 %v61_v20 }
  0x93   :  { %325 = vmatmul.mubr.f32.gmra.mrb[20].mxu0 %v60_v21 }
  0x94   :  { %486 = vmatmul.mubr.f32.gmra.mrb[20].mxu1 %v60_v21  ;;  %330 = vmatprep.mubr.f32.mxu0 %v63_v22 }
  0x95   :  { %491 = vmatprep.mubr.f32.mxu1 %v63_v22 }
  0x97   :  { %331 = vmatmul.mubr.f32.gmra.mrb[22].mxu0 %v62_v23 }
  0x98   :  { %492 = vmatmul.mubr.f32.gmra.mrb[22].mxu1 %v62_v23  ;;  %336 = vmatprep.mubr.f32.mxu0 %v65_v24 }
  0x99   :  { %497 = vmatprep.mubr.f32.mxu1 %v65_v24 }
  0x9b   :  { %337 = vmatmul.mubr.f32.gmra.mrb[24].mxu0 %v64_v25 }
  0x9c   :  { %498 = vmatmul.mubr.f32.gmra.mrb[24].mxu1 %v64_v25  ;;  %342 = vmatprep.mubr.f32.mxu0 %v67_v26 }
  0x9d   :  { %503 = vmatprep.mubr.f32.mxu1 %v67_v26 }
  0x9f   :  { %343 = vmatmul.mubr.f32.gmra.mrb[26].mxu0 %v66_v27 }
  0xa0   :  { %504 = vmatmul.mubr.f32.gmra.mrb[26].mxu1 %v66_v27  ;;  %348 = vmatprep.mubr.f32.mxu0 %v69_v28 }
  0xa1   :  { %509 = vmatprep.mubr.f32.mxu1 %v69_v28 }
  0xa3   :  { %349 = vmatmul.mubr.f32.gmra.mrb[28].mxu0 %v68_v29 }
  0xa4   :  { %510 = vmatmul.mubr.f32.gmra.mrb[28].mxu1 %v68_v29  ;;  %354 = vmatprep.mubr.f32.mxu0 %v71_v30 }
  0xa5   :  { %515 = vmatprep.mubr.f32.mxu1 %v71_v30 }
  0xa7   :  { %355 = vmatmul.mubr.f32.gmra.mrb[30].mxu0 %v70_v31 }
  0xa8   :  { %516 = vmatmul.mubr.f32.gmra.mrb[30].mxu1 %v70_v31 }
 0x13e   :  { %v266_v32 = vpop.f32.mrb[0].mxu0 }
 0x13f   :  { %v427_v33 = vpop.f32.mrb[0].mxu1  ;;  %v268_v34 = vpop.f32.mrb[1].mxu0  ;;  %v587_v36 = vmul.f32 0.0625, %v266_v32 }
 0x140   :  { %v429_v35 = vpop.f32.mrb[1].mxu1  ;;  %v720_v37 = vmul.f32 0.33333334, %v427_v33  ;;  %v651_v39 = vmul.f32 0.16666667, %v268_v34 }
 0x141   :  { %v812_v46 = vmul.f32 0.5, %v429_v35 }
 0x142   :  { %v272_v38 = vpop.f32.mrb[2].mxu0 }
 0x143   :  { %v590_v40 = vmul.f32 0.0625, %v272_v38  ;;  %v433_v41 = vpop.f32.mrb[2].mxu1  ;;  %v274_v42 = vpop.f32.mrb[3].mxu0 }
 0x144   :  { %v722_v43 = vmul.f32 0.33333334, %v433_v41  ;;  %v653_v44 = vmul.f32 0.16666667, %v274_v42  ;;  %v435_v45 = vpop.f32.mrb[3].mxu1 }
 0x145   :  { %v591_v47 = vadd.f32 %v590_v40, %v587_v36  ;;  %v814_v48 = vmul.f32 0.5, %v435_v45 }
 0x146   :  { %v723_v49 = vadd.f32 %v722_v43, %v720_v37  ;;  %v654_v50 = vadd.f32 %v653_v44, %v651_v39  ;;  %v278_v51 = vpop.f32.mrb[4].mxu0 }
 0x147   :  { %v594_v52 = vmul.f32 0.0625, %v278_v51  ;;  %v439_v53 = vpop.f32.mrb[4].mxu1  ;;  %v280_v54 = vpop.f32.mrb[5].mxu0  ;;  %v815_v55 = vadd.f32 %v814_v48, %v812_v46 }
 0x148   :  { %v725_v56 = vmul.f32 0.33333334, %v439_v53  ;;  %v656_v57 = vmul.f32 0.16666667, %v280_v54  ;;  %v441_v58 = vpop.f32.mrb[5].mxu1  ;;  %v734_v2 = vmul.f32 0.25, %v439_v53 }
 0x149   :  { %v595_v59 = vadd.f32 %v594_v52, %v591_v47  ;;  %817 = vrot.lane.b32.xlu1 %v815_v55, %s1138_s1  ;;  %v825_v6 = vmul.f32 0.5, %v441_v58 }
 0x14a   :  { %v726_v60 = vadd.f32 %v725_v56, %v723_v49  ;;  %v657_v61 = vadd.f32 %v656_v57, %v654_v50  ;;  %v284_v62 = vpop.f32.mrb[6].mxu0 }
 0x14b   :  { %v598_v63 = vmul.f32 0.0625, %v284_v62  ;;  %v445_v0 = vpop.f32.mrb[6].mxu1  ;;  %v286_v1 = vpop.f32.mrb[7].mxu0 }
 0x14c   :  { %v736_v3 = vmul.f32 0.25, %v445_v0  ;;  %v659_v4 = vmul.f32 0.16666667, %v286_v1  ;;  %v447_v5 = vpop.f32.mrb[7].mxu1 }
 0x14d   :  { %v599_v7 = vadd.f32 %v598_v63, %v595_v59  ;;  %v827_v8 = vmul.f32 0.5, %v447_v5  ;;  %728 = vrot.lane.b32.xlu1 %v726_v60, %s1139_s8 }
 0x14e   :  { %v737_v9 = vadd.f32 %v736_v3, %v734_v2  ;;  %v660_v10 = vadd.f32 %v659_v4, %v657_v61  ;;  %v290_v11 = vpop.f32.mrb[8].mxu0 }
 0x14f   :  { %v602_v12 = vmul.f32 0.0625, %v290_v11  ;;  %v451_v13 = vpop.f32.mrb[8].mxu1  ;;  %v292_v14 = vpop.f32.mrb[9].mxu0  ;;  %v828_v15 = vadd.f32 %v827_v8, %v825_v6 }
 0x150   :  { %v739_v16 = vmul.f32 0.25, %v451_v13  ;;  %v662_v17 = vmul.f32 0.16666667, %v292_v14  ;;  %v453_v18 = vpop.f32.mrb[9].mxu1 }
 0x151   :  { %v603_v19 = vadd.f32 %v602_v12, %v599_v7  ;;  %830 = vrot.lane.b32.xlu0 %v828_v15, %s1140_s9  ;;  %v836_v29 = vmul.f32 0.5, %v453_v18 }
 0x152   :  { %v740_v20 = vadd.f32 %v739_v16, %v737_v9  ;;  %v663_v21 = vadd.f32 %v662_v17, %v660_v10  ;;  %v296_v22 = vpop.f32.mrb[10].mxu0 }
 0x153   :  { %v606_v23 = vmul.f32 0.0625, %v296_v22  ;;  %v457_v24 = vpop.f32.mrb[10].mxu1  ;;  %v298_v25 = vpop.f32.mrb[11].mxu0 }
 0x154   :  { %v742_v26 = vmul.f32 0.25, %v457_v24  ;;  %v665_v27 = vmul.f32 0.16666667, %v298_v25  ;;  %v459_v28 = vpop.f32.mrb[11].mxu1  ;;  %v751_v35 = vmul.f32 0.33333334, %v457_v24 }
 0x155   :  { %v607_v30 = vadd.f32 %v606_v23, %v603_v19  ;;  %v838_v31 = vmul.f32 0.5, %v459_v28 }
 0x156   :  { %v743_v32 = vadd.f32 %v742_v26, %v740_v20  ;;  %v666_v33 = vadd.f32 %v665_v27, %v663_v21  ;;  %v302_v34 = vpop.f32.mrb[12].mxu0 }
 0x157   :  { %v839_v36 = vadd.f32 %v838_v31, %v836_v29  ;;  %v610_v37 = vmul.f32 0.0625, %v302_v34  ;;  %v463_v38 = vpop.f32.mrb[12].mxu1  ;;  %v304_v39 = vpop.f32.mrb[13].mxu0 }
 0x158   :  { %v753_v40 = vmul.f32 0.33333334, %v463_v38  ;;  %745 = vrot.lane.b32.xlu0 %v743_v32, %s1141_s10  ;;  %v676_v41 = vmul.f32 0.16666667, %v304_v39  ;;  %v465_v42 = vpop.f32.mrb[13].mxu1 }
 0x159   :  { %v611_v43 = vadd.f32 %v610_v37, %v607_v30  ;;  %v847_v53 = vmul.f32 0.5, %v465_v42 }
 0x15a   :  { %v754_v44 = vadd.f32 %v753_v40, %v751_v35  ;;  %v677_v45 = vadd.f32 %v676_v41, %v665_v27  ;;  %v308_v46 = vpop.f32.mrb[14].mxu0 }
 0x15b   :  { %v614_v47 = vmul.f32 0.0625, %v308_v46  ;;  %v469_v48 = vpop.f32.mrb[14].mxu1  ;;  %v310_v49 = vpop.f32.mrb[15].mxu0 }
 0x15c   :  { %v756_v50 = vmul.f32 0.33333334, %v469_v48  ;;  %v471_v51 = vpop.f32.mrb[15].mxu1  ;;  %668 = vrot.lane.b32.xlu0 %v666_v33, %s1142_s11  ;;  %v679_v52 = vmul.f32 0.16666667, %v310_v49 }
 0x15d   :  { %v615_v54 = vadd.f32 %v614_v47, %v611_v43  ;;  %v849_v55 = vmul.f32 0.5, %v471_v51 }
 0x15e   :  { %v757_v56 = vadd.f32 %v756_v50, %v754_v44  ;;  %v680_v57 = vadd.f32 %v679_v52, %v677_v45  ;;  %v314_v58 = vpop.f32.mrb[16].mxu0 }
 0x15f   :  { %v850_v59 = vadd.f32 %v849_v55, %v847_v53  ;;  %v618_v60 = vmul.f32 0.0625, %v314_v58  ;;  %v475_v61 = vpop.f32.mrb[16].mxu1  ;;  %v316_v62 = vpop.f32.mrb[17].mxu0 }
 0x160   :  { %759 = vrot.lane.b32.xlu1 %v757_v56, %s1143_s12  ;;  %v477_v63 = vpop.f32.mrb[17].mxu1  ;;  %841 = vrot.lane.b32.xlu0 %v839_v36, %s1138_s1  ;;  %v682_v0 = vmul.f32 0.16666667, %v316_v62  ;;  %v767_v4 = vmul.f32 0.33333334, %v475_v61 }
 0x161   :  { %v619_v1 = vadd.f32 %v618_v60, %v615_v54  ;;  %v857_v11 = vmul.f32 0.5, %v477_v63 }
 0x162   :  { %v683_v2 = vadd.f32 %v682_v0, %v680_v57  ;;  %v320_v3 = vpop.f32.mrb[18].mxu0 }
 0x163   :  { %v622_v5 = vmul.f32 0.0625, %v320_v3  ;;  %v481_v6 = vpop.f32.mrb[18].mxu1  ;;  %v322_v7 = vpop.f32.mrb[19].mxu0 }
 0x164   :  { %v769_v8 = vmul.f32 0.33333334, %v481_v6  ;;  %852 = vrot.lane.b32.xlu1 %v850_v59, %s1140_s9  ;;  %v685_v9 = vmul.f32 0.16666667, %v322_v7  ;;  %v483_v10 = vpop.f32.mrb[19].mxu1 }
 0x165   :  { %v623_v12 = vadd.f32 %v622_v5, %v619_v1  ;;  %v859_v13 = vmul.f32 0.5, %v483_v10 }
 0x166   :  { %v770_v14 = vadd.f32 %v769_v8, %v767_v4  ;;  %v686_v15 = vadd.f32 %v685_v9, %v683_v2  ;;  %v326_v16 = vpop.f32.mrb[20].mxu0 }
 0x167   :  { %v860_v17 = vadd.f32 %v859_v13, %v857_v11  ;;  %v626_v18 = vmul.f32 0.0625, %v326_v16  ;;  %v487_v19 = vpop.f32.mrb[20].mxu1  ;;  %v328_v20 = vpop.f32.mrb[21].mxu0 }
 0x168   :  { %v772_v21 = vmul.f32 0.33333334, %v487_v19  ;;  %v688_v22 = vmul.f32 0.16666667, %v328_v20  ;;  %v489_v23 = vpop.f32.mrb[21].mxu1  ;;  %v781_v31 = vmul.f32 0.25, %v487_v19 }
 0x169   :  { %v627_v24 = vadd.f32 %v626_v18, %v623_v12  ;;  %862 = vrot.lane.b32.xlu1 %v860_v17, %s1138_s1  ;;  %v868_v35 = vmul.f32 0.5, %v489_v23 }
 0x16a   :  { %v773_v25 = vadd.f32 %v772_v21, %v770_v14  ;;  %v689_v26 = vadd.f32 %v688_v22, %v686_v15  ;;  %v332_v27 = vpop.f32.mrb[22].mxu0 }
 0x16b   :  { %v630_v28 = vmul.f32 0.0625, %v332_v27  ;;  %v493_v29 = vpop.f32.mrb[22].mxu1  ;;  %v334_v30 = vpop.f32.mrb[23].mxu0 }
 0x16c   :  { %v783_v32 = vmul.f32 0.25, %v493_v29  ;;  %v495_v33 = vpop.f32.mrb[23].mxu1  ;;  %775 = vrot.lane.b32.xlu0 %v773_v25, %s1144_s13  ;;  %v699_v34 = vmul.f32 0.16666667, %v334_v30 }
 0x16d   :  { %v631_v36 = vadd.f32 %v630_v28, %v627_v24  ;;  %v870_v37 = vmul.f32 0.5, %v495_v33 }
 0x16e   :  { %v784_v38 = vadd.f32 %v783_v32, %v781_v31  ;;  %v700_v39 = vadd.f32 %v699_v34, %v688_v22  ;;  %v338_v40 = vpop.f32.mrb[24].mxu0 }
 0x16f   :  { %v871_v41 = vadd.f32 %v870_v37, %v868_v35  ;;  %v634_v42 = vmul.f32 0.0625, %v338_v40  ;;  %v499_v43 = vpop.f32.mrb[24].mxu1  ;;  %v340_v44 = vpop.f32.mrb[25].mxu0 }
 0x170   :  { %v786_v45 = vmul.f32 0.25, %v499_v43  ;;  %v501_v46 = vpop.f32.mrb[25].mxu1  ;;  %691 = vrot.lane.b32.xlu0 %v689_v26, %s1145_s14  ;;  %v702_v47 = vmul.f32 0.16666667, %v340_v44 }
 0x171   :  { %v635_v48 = vadd.f32 %v634_v42, %v631_v36  ;;  %v878_v58 = vmul.f32 0.5, %v501_v46 }
 0x172   :  { %v787_v49 = vadd.f32 %v786_v45, %v784_v38  ;;  %v703_v50 = vadd.f32 %v702_v47, %v700_v39  ;;  %v344_v51 = vpop.f32.mrb[26].mxu0 }
 0x173   :  { %v638_v52 = vmul.f32 0.0625, %v344_v51  ;;  %v505_v53 = vpop.f32.mrb[26].mxu1  ;;  %v346_v54 = vpop.f32.mrb[27].mxu0 }
 0x174   :  { %v789_v55 = vmul.f32 0.25, %v505_v53  ;;  %v507_v56 = vpop.f32.mrb[27].mxu1  ;;  %873 = vrot.lane.b32.xlu0 %v871_v41, %s1140_s9  ;;  %v705_v57 = vmul.f32 0.16666667, %v346_v54  ;;  %v798_v0 = vmul.f32 0.33333334, %v505_v53 }
 0x175   :  { %v639_v59 = vadd.f32 %v638_v52, %v635_v48  ;;  %v880_v60 = vmul.f32 0.5, %v507_v56 }
 0x176   :  { %v790_v61 = vadd.f32 %v789_v55, %v787_v49  ;;  %v706_v62 = vadd.f32 %v705_v57, %v703_v50  ;;  %v350_v63 = vpop.f32.mrb[28].mxu0 }
 0x177   :  { %v881_v1 = vadd.f32 %v880_v60, %v878_v58  ;;  %v642_v2 = vmul.f32 0.0625, %v350_v63  ;;  %v511_v3 = vpop.f32.mrb[28].mxu1  ;;  %v352_v4 = vpop.f32.mrb[29].mxu0 }
 0x178   :  { %v800_v5 = vmul.f32 0.33333334, %v511_v3  ;;  %v513_v6 = vpop.f32.mrb[29].mxu1  ;;  %792 = vrot.lane.b32.xlu0 %v790_v61, %s1146_s15  ;;  %v708_v7 = vmul.f32 0.16666667, %v352_v4 }
 0x179   :  { %v643_v8 = vadd.f32 %v642_v2, %v639_v59  ;;  %v889_v18 = vmul.f32 0.5, %v513_v6 }
 0x17a   :  { %v801_v9 = vadd.f32 %v800_v5, %v798_v0  ;;  %v709_v10 = vadd.f32 %v708_v7, %v706_v62  ;;  %v356_v11 = vpop.f32.mrb[30].mxu0 }
 0x17b   :  { %v646_v12 = vmul.f32 0.0625, %v356_v11  ;;  %v517_v13 = vpop.f32.mrb[30].mxu1  ;;  %v358_v14 = vpop.f32.mrb[31].mxu0 }
 0x17c   :  { %v803_v15 = vmul.f32 0.33333334, %v517_v13  ;;  %v711_v16 = vmul.f32 0.16666667, %v358_v14  ;;  %v519_v17 = vpop.f32.mrb[31].mxu1 }
 0x17d   :  { %v647_v19 = vadd.f32 %v646_v12, %v643_v8  ;;  %v891_v20 = vmul.f32 0.5, %v519_v17 }
 0x17e   :  { %v804_v21 = vadd.f32 %v803_v15, %v801_v9  ;;  %v712_v22 = vadd.f32 %v711_v16, %v709_v10 }
 0x17f   :  { %649 = vst.msk [vmem:[#allocation8] sm:$0xff] %vm648_vm0, %v647_v19  ;;  %v892_v23 = vadd.f32 %v891_v20, %v889_v18 }
 0x180   :  { %806 = vrot.lane.b32.xlu1 %v804_v21, %s1147_s16 }
 0x181   :  { %894 = vrot.lane.b32.xlu0 %v892_v23, %s1140_s9 }
 0x184   :  { %714 = vrot.lane.b32.xlu1 %v712_v22, %s1148_s17 }
 0x188   :  { %883 = vrot.lane.b32.xlu1 %v881_v1, %s1138_s1 }
 0x1bb   :  { %v818_v24 = vpop.permute.xlu1 %817 }
 0x1bc   :  { %823 = vst.msk [vmem:[#allocation8 + $0x10] sm:$0xff] %vm822_vm1, %v818_v24 }
 0x1bf   :  { %v729_v27 = vpop.permute.xlu1 %728 }
 0x1c3   :  { %v831_v25 = vpop.permute.xlu0 %830 }
 0x1c4   :  { %834 = vst.msk [vmem:[#allocation8 + $0x10] sm:$0xff] %vm833_vm2, %v831_v25 }
 0x1ca   :  { %v746_v26 = vpop.permute.xlu0 %745 }
 0x1ce   :  { %v669_v28 = vpop.permute.xlu0 %668 }
 0x1cf   :  { %672 = vst.msk [vmem:[#allocation8] sm:$0xff] %vm671_vm3, %v669_v28 }
 0x1d2   :  { %v760_v29 = vpop.permute.xlu1 %759  ;;  %v842_v30 = vpop.permute.xlu0 %841 }
 0x1d3   :  { %765 = vst.msk [vmem:[#allocation8 + $0x8] sm:$0xff] %vm764_vm4, %v760_v29 }
 0x1d4   :  { %844 = vst.msk [vmem:[#allocation8 + $0x10] sm:$0xff] %vm820_vm5, %v842_v30 }
 0x1d5   :  { %845 = vst.msk [vmem:[#allocation8 + $0x18] sm:$0xff] %vm822_vm1, %v842_v30 }
 0x1d6   :  { %v853_v31 = vpop.permute.xlu1 %852 }
 0x1d7   :  { %855 = vst.msk [vmem:[#allocation8 + $0x18] sm:$0xff] %vm833_vm2, %v853_v31 }
 0x1db   :  { %v863_v32 = vpop.permute.xlu1 %862 }
 0x1dc   :  { %865 = vst.msk [vmem:[#allocation8 + $0x18] sm:$0xff] %vm820_vm5, %v863_v32 }
 0x1dd   :  { %866 = vst.msk [vmem:[#allocation8 + $0x20] sm:$0xff] %vm822_vm1, %v863_v32 }
 0x1de   :  { %v776_v33 = vpop.permute.xlu0 %775 }
 0x1df   :  { %779 = vst.msk [vmem:[#allocation8 + $0x8] sm:$0xff] %vm778_vm6, %v776_v33 }
 0x1e2   :  { %v692_v34 = vpop.permute.xlu0 %691 }
 0x1e3   :  { %695 = vst.msk [vmem:[#allocation8] sm:$0xff] %vm694_vm7, %v692_v34 }
 0x1e6   :  { %v874_v35 = vpop.permute.xlu0 %873 }
 0x1e7   :  { %876 = vst.msk [vmem:[#allocation8 + $0x20] sm:$0xff] %vm833_vm2, %v874_v35 }
 0x1ea   :  { %v793_v36 = vpop.permute.xlu0 %792 }
 0x1eb   :  { %796 = vst.msk [vmem:[#allocation8 + $0x8] sm:$0xff] %vm795_vm8, %v793_v36 }
 0x1f2   :  { %v807_v37 = vpop.permute.xlu1 %806 }
 0x1f3   :  { %810 = vst.msk [vmem:[#allocation8 + $0x8] sm:$0xff] %vm809_vm9, %v807_v37  ;;  %v895_v40 = vpop.permute.xlu0 %894 }
 0x1f4   :  { %821 = vst.msk [vmem:[#allocation8 + $0x8] sm:$0xff] %vm820_vm5, %v818_v24 }
 0x1f6   :  { %v715_v38 = vpop.permute.xlu1 %714 }
 0x1f7   :  { %718 = vst.msk [vmem:[#allocation8] sm:$0xff] %vm717_vm10, %v715_v38 }
 0x1f8   :  { %732 = vst.msk [vmem:[#allocation8] sm:$0xff] %vm731_vm11, %v729_v27 }
 0x1f9   :  { %749 = vst.msk [vmem:[#allocation8] sm:$0xff] %vm748_vm12, %v746_v26 }
 0x1fa   :  { %v884_v39 = vpop.permute.xlu1 %883  ;;  %763 = vst.msk [vmem:[#allocation8] sm:$0xff] %vm762_vm13, %v760_v29 }
 0x1fb   :  { %886 = vst.msk [vmem:[#allocation8 + $0x20] sm:$0xff] %vm820_vm5, %v884_v39 }
 0x1fc   :  { %887 = vst.msk [vmem:[#allocation8 + $0x28] sm:$0xff] %vm822_vm1, %v884_v39 }
 0x1fd   :  { %897 = vst.msk [vmem:[#allocation8 + $0x28] sm:$0xff] %vm833_vm2, %v895_v40 }
 0x1fe   :  { %1115 = shalt.err (!%p1112_p6)
}
 0x1ff   :  { %s1116_s23 = scalar_lea.hbm %s1223_s2, 768 }
 0x200   :  { %p1117_p7 = scmp.ne.s32.totalorder %s1223_s2, %s1116_s23  ;;  %p1120_p8 = scmp.lt.u32.totalorder %s1116_s23, %s1223_s2 }
 0x202   :  { %p1122_p9 = pnand %p1120_p8, %p1117_p7 }
 0x204   :  { %1125 = shalt.err (!%p1122_p9)
}
 0x205   :  { %907 = dma.vmem_to_hbm [thread:$0]  %s905_s19, 768, %s1223_s2, [#allocation5]  }
 0x206   :  { %1130 = dma.done.wait [#allocation5], 768  }
 0x207   :  { %1131 = vsyncadd [#allocation5], 4294966528 }
 0x208   :  { %911 = vsyncpa [#allocation4], 1 }
 0x209   :  { %912 = vsyncpa [#allocation7], 1 }
 0x20a   :  { %913 = vsyncpa [#allocation5], 1 }

</bundles_post_ra>
